<compile_context>
chip_gen: v7x
topology: tpu7x:2x2x1
jax: 0.10.0
libtpu: 0.0.40
codegen_flags: <defaults>
</compile_context>

<pallas_src>
import functools

import jax
import jax.numpy as jnp
from jax.experimental import pallas as pl
from jax.experimental.pallas import tpu as pltpu


_VMEM_LIMIT = 48 * 1024 * 1024  # fits v7x (64 MiB physical); v5e/v6e have 128 MiB.


# ---------------------------------------------------------------------------
# Kernel 1: im2col panel in VMEM scratch -> one MXU matmul (K = KH*KW*IC,
#           N = OCp multiple of 128), f32 value accumulator, bf16 output,
#           fused per-tile BatchNorm partial statistics (f32).
# ---------------------------------------------------------------------------
def _conv_stats_kernel(x_ref, w_ref, y_ref, stat_ref, panel_ref, *,
                       ks, stride, toh, ow, ic):
    # x_ref:     (1, Hp, Wp, IC)        bf16  whole padded image (revisited across r)
    # w_ref:     (KH*KW*IC, OCp)        bf16  im2col-ordered, OC zero-padded to OCp
    # y_ref:     (1, TOH*OW, OCp)       bf16  conv output tile
    # stat_ref:  (1, 1, 2, OCp)         f32   [channel sum; channel sum-of-squares]
    # panel_ref: (TOH, OW, KH*KW*IC)    bf16  im2col panel scratch
    r = pl.program_id(1)
    row0 = pl.multiple_of(r * (toh * stride), toh * stride)

    for kh in range(ks):
        for kw in range(ks):
            if stride == 1:
                win = x_ref[0, pl.ds(row0 + kh, toh), kw:kw + ow, :]
            else:
                # TODO(synk): strided (s > 1) window reads are untested on Mosaic.
                win = x_ref[0, pl.ds(row0 + kh, toh, stride),
                            pl.ds(kw, ow, stride), :]
            c0 = (kh * ks + kw) * ic
            panel_ref[:, :, c0:c0 + ic] = win          # no per-tap value reshape

    panel = panel_ref[...].reshape(toh * ow, ks * ks * ic)          # one relayout
    acc = jnp.dot(panel, w_ref[...],
                  preferred_element_type=jnp.float32)               # (TOH*OW, OCp) f32

    y_ref[0] = acc.astype(y_ref.dtype)                              # single bf16 store
    stat_ref[0, 0] = jnp.concatenate(
        [jnp.sum(acc, axis=0, keepdims=True),
         jnp.sum(acc * acc, axis=0, keepdims=True)], axis=0)        # (2, OCp) f32


# ---------------------------------------------------------------------------
# Kernel 2: fused BN affine + ReLU with the NHWC->NCHW transpose folded in.
#           Reads bf16, computes in f32, writes lane-dense (OC, tile) f32 blocks.
# ---------------------------------------------------------------------------
def _bn_relu_t_kernel(y_ref, scale_ref, bias_ref, o_ref, *, oc):
    # y_ref: (1, TSP, OCp) bf16; scale/bias: (1, OCp) f32; o_ref: (1, OC, TSP) f32
    y = y_ref[0].astype(jnp.float32)
    z = jnp.maximum(y * scale_ref[...] + bias_ref[...], 0.0)        # (TSP, OCp)
    o_ref[0] = jnp.transpose(z, (1, 0))[:oc, :]                     # (OC, TSP)


def _pick_oh_tile(n, oh, ow, ocp, *, bytes_per_elem=4, budget=2 << 20, min_steps=4):
    """Largest divisor t of OH with a layout-legal (t*OW, OCp) block under `budget`,
    preferring n*(OH/t) >= min_steps grid steps for pipeline depth / megacore."""
    cands = [t for t in range(1, oh + 1)
             if oh % t == 0
             and ((t * ow) % 8 == 0 or t == oh)
             and t * ow * ocp * bytes_per_elem <= budget]
    if not cands:
        return oh  # whole-image fallback (always layout-legal)
    deep = [t for t in cands if n * (oh // t) >= min_steps]
    return max(deep) if deep else max(cands)


def _pick_sp_tile(n, s, ocp, oc, *, budget=4 << 20, min_steps=4):
    """Largest divisor t of S=OH*OW that is a multiple of 128 (or S itself) and fits."""
    cands = [t for t in range(1, s + 1)
             if s % t == 0
             and (t % 128 == 0 or t == s)
             and t * (ocp * 2 + ocp * 4 + oc * 4) <= budget]
    if not cands:
        return s
    deep = [t for t in cands if n * (s // t) >= min_steps]
    return max(deep) if deep else max(cands)


def crb_forward(x_nchw, weight, gamma, beta, *, stride, padding, eps=1e-5):
    """Conv2d(bias=False) -> BatchNorm2d (training-mode batch stats) -> ReLU (NCHW)."""
    n, ic, h, w = x_nchw.shape
    oc, ic_w, kh_sz, kw_sz = weight.shape
    assert ic == ic_w and kh_sz == kw_sz
    ks, s, p = kh_sz, stride, padding
    oh = (h + 2 * p - ks) // s + 1
    ow = (w + 2 * p - ks) // s + 1
    hp, wp = h + 2 * p, w + 2 * p
    sflat = oh * ow
    m = n * sflat
    ocp = ((oc + 127) // 128) * 128       # lane-dense MXU N dim / stores / stats

    # NCHW -> NHWC in bf16, pad in bf16 (half the pad traffic vs f32).
    x_nhwc = jnp.transpose(x_nchw, (0, 2, 3, 1)).astype(jnp.bfloat16)
    x_pad = jnp.pad(x_nhwc, ((0, 0), (p, p), (p, p), (0, 0)))
    # TODO(synk): the NCHW->NHWC entry transpose is still a separate XLA pass; folding
    # it into kernel 1 would need an in-kernel (IC,Hp,Wp)->(Hp,Wp,IC) relayout.

    # PyTorch [OC, IC, KH, KW] -> im2col-ordered [(KH*KW*IC), OCp], OC zero-padded.
    w2 = jnp.transpose(weight, (2, 3, 1, 0)).reshape(ks * ks * ic, oc)
    w2 = jnp.pad(w2, ((0, 0), (0, ocp - oc))).astype(jnp.bfloat16)

    toh = _pick_oh_tile(n, oh, ow, ocp)
    nrt = oh // toh

    # ---- Kernel 1: fused conv + BN partial statistics ------------------------
    conv_kernel = functools.partial(_conv_stats_kernel, ks=ks, stride=s,
                                    toh=toh, ow=ow, ic=ic)
    conv_out, stats = pl.pallas_call(
        conv_kernel,
        out_shape=(
            jax.ShapeDtypeStruct((n, sflat, ocp), jnp.bfloat16),
            jax.ShapeDtypeStruct((n, nrt, 2, ocp), jnp.float32),
        ),
        grid_spec=pltpu.PrefetchScalarGridSpec(
            num_scalar_prefetch=0,
            grid=(n, nrt),
            in_specs=[
                # Whole padded image; block index constant in r => DMA'd once per image.
                # TODO(synk): for very large H, switch to a halo'd row-window block
                # (pl.Element offsets) to bound per-step VMEM on v7x (64 MiB physical).
                pl.BlockSpec((1, hp, wp, ic), lambda i, r: (i, 0, 0, 0)),
                pl.BlockSpec((ks * ks * ic, ocp), lambda i, r: (0, 0)),
            ],
            out_specs=(
                pl.BlockSpec((1, toh * ow, ocp), lambda i, r: (i, r, 0)),
                pl.BlockSpec((1, 1, 2, ocp), lambda i, r: (i, r, 0, 0)),
            ),
            scratch_shapes=[pltpu.VMEM((toh, ow, ks * ks * ic), jnp.bfloat16)],
        ),
        compiler_params=pltpu.CompilerParams(
            dimension_semantics=("parallel", "parallel"),
            vmem_limit_bytes=_VMEM_LIMIT),
    )(x_pad, w2)

    # ---- BN scale/bias from fused partials (f32, training mode, real OC only) ----
    tot = jnp.sum(stats, axis=(0, 1))                     # (2, OCp)
    mean = tot[0, :oc] / m
    var = jnp.maximum(tot[1, :oc] / m - mean * mean, 0.0)  # biased (training) variance
    # TODO(synk): E[x^2]-E[x]^2 in f32 can cancel when |mean|>>std and M is huge; a
    # Welford/Chan combine of per-tile (mean, M2) partials is the robust alternative.
    inv_std = jax.lax.rsqrt(var + eps)
    scale = gamma.astype(jnp.float32) * inv_std
    bias = beta.astype(jnp.float32) - mean * scale
    scale_p = jnp.pad(scale, (0, ocp - oc)).reshape(1, ocp)
    bias_p = jnp.pad(bias, (0, ocp - oc)).reshape(1, ocp)

    # ---- Kernel 2: BN affine + ReLU with folded exit transpose ----------------
    tsp = _pick_sp_tile(n, sflat, ocp, oc)
    bn_kernel = functools.partial(_bn_relu_t_kernel, oc=oc)
    out3 = pl.pallas_call(
        bn_kernel,
        out_shape=jax.ShapeDtypeStruct((n, oc, sflat), jnp.float32),
        grid_spec=pltpu.PrefetchScalarGridSpec(
            num_scalar_prefetch=0,
            grid=(n, sflat // tsp),
            in_specs=[
                pl.BlockSpec((1, tsp, ocp), lambda i, t: (i, t, 0)),
                pl.BlockSpec((1, ocp), lambda i, t: (0, 0)),
                pl.BlockSpec((1, ocp), lambda i, t: (0, 0)),
            ],
            out_specs=pl.BlockSpec((1, oc, tsp), lambda i, t: (i, 0, t)),
        ),
        compiler_params=pltpu.CompilerParams(
            dimension_semantics=("parallel", "parallel"),
            vmem_limit_bytes=_VMEM_LIMIT),
    )(conv_out, scale_p, bias_p)

    # Free, layout-preserving reshape (no transpose HBM pass).
    return out3.reshape(n, oc, oh, ow)


def _reference_crb(x_nchw, weight, gamma, beta, *, stride, padding, eps=1e-5,
                   mxu_bf16=False, store_bf16=False):
    """Pure-JAX reference. mxu_bf16: round conv inputs to bf16 (f32 accumulation);
    store_bf16: round the conv output to bf16 before the BN affine (stats stay f32)."""
    xd, wd = x_nchw, weight
    if mxu_bf16:
        xd = xd.astype(jnp.bfloat16).astype(jnp.float32)
        wd = wd.astype(jnp.bfloat16).astype(jnp.float32)
    y = jax.lax.conv_general_dilated(
        xd.astype(jnp.float32), wd.astype(jnp.float32),
        window_strides=(stride, stride),
        padding=[(padding, padding), (padding, padding)],
        dimension_numbers=("NCHW", "OIHW", "NCHW"),
        preferred_element_type=jnp.float32)
    mean = jnp.mean(y, axis=(0, 2, 3), keepdims=True)
    var = jnp.mean(jnp.square(y - mean), axis=(0, 2, 3), keepdims=True)
    y_used = y.astype(jnp.bfloat16).astype(jnp.float32) if store_bf16 else y
    yhat = (y_used - mean) * jax.lax.rsqrt(var + eps)
    yhat = yhat * gamma.reshape(1, -1, 1, 1) + beta.reshape(1, -1, 1, 1)
    return jnp.maximum(yhat, 0.0)


if __name__ == "__main__":
    # CRB(ic=4, oc=8, ks=3, s=1, p=1) on x of shape [2, 4, 16, 16]
    ic, oc, ks, s, p = 4, 8, 3, 1, 1
    key = jax.random.PRNGKey(0)
    kx, kwt = jax.random.split(key)

    x = jax.random.normal(kx, (2, ic, 16, 16), dtype=jnp.float32)
    weight = jax.random.normal(kwt, (oc, ic, ks, ks), dtype=jnp.float32) * 0.1
    # PyTorch BatchNorm2d default init: weight=1, bias=0.
    gamma = jnp.ones((oc,), dtype=jnp.float32)
    beta = jnp.zeros((oc,), dtype=jnp.float32)

    fwd = jax.jit(functools.partial(crb_forward, stride=s, padding=p))
    out = jax.block_until_ready(fwd(x, weight, gamma, beta))
    assert out.shape == (2, oc, 16, 16), out.shape

    # Precision-matched reference: bf16 conv inputs, f32 accumulation, bf16-stored conv.
    ref_m = _reference_crb(x, weight, gamma, beta, stride=s, padding=p,
                           mxu_bf16=True, store_bf16=True)
    assert jnp.allclose(out, ref_m, atol=1e-2, rtol=1e-2), \
        float(jnp.max(jnp.abs(out - ref_m)))

    # Loose check vs the pure-f32 PyTorch-equivalent reference.
    ref_f32 = _reference_crb(x, weight, gamma, beta, stride=s, padding=p)
    assert jnp.allclose(out, ref_f32, atol=6e-2, rtol=6e-2), \
        float(jnp.max(jnp.abs(out - ref_f32)))

    print("KERNEL_OK")
</pallas_src>

<mosaic_0001>
module attributes {stable_mosaic.version = 11 : i64} {
  func.func @_bn_relu_t_kernel(%arg0: i32, %arg1: i32, %arg2: memref<1x128x128xbf16, #tpu.memory_space<vmem>>, %arg3: memref<1x128xf32, #tpu.memory_space<vmem>>, %arg4: memref<1x128xf32, #tpu.memory_space<vmem>>, %arg5: memref<1x8x128xf32, #tpu.memory_space<vmem>>) attributes {dimension_semantics = [#tpu.dimension_semantics<parallel>, #tpu.dimension_semantics<parallel>], iteration_bounds = array<i64: 2, 2>, scalar_prefetch = 0 : i64, scratch_operands = 0 : i64, tpu.core_type = #tpu.core_type<tc>, window_params = [{transform_indices = @transform_0, window_bounds = array<i64: 1, 128, 128>}, {pipeline_mode = #tpu.pipeline_mode<synchronous>, transform_indices = @transform_1, window_bounds = array<i64: 1, 128>}, {pipeline_mode = #tpu.pipeline_mode<synchronous>, transform_indices = @transform_2, window_bounds = array<i64: 1, 128>}, {transform_indices = @transform_3, window_bounds = array<i64: 1, 8, 128>}]} {
    %c0 = arith.constant 0 : index
    %c0_0 = arith.constant 0 : index
    %c0_1 = arith.constant 0 : index
    %0 = vector.load %arg2[%c0, %c0_0, %c0_1] : memref<1x128x128xbf16, #tpu.memory_space<vmem>>, vector<1x128x128xbf16>
    %1 = vector.shape_cast %0 : vector<1x128x128xbf16> to vector<128x128xbf16>
    %2 = arith.extf %1 : vector<128x128xbf16> to vector<128x128xf32>
    %c0_2 = arith.constant 0 : index
    %c0_3 = arith.constant 0 : index
    %3 = vector.load %arg3[%c0_2, %c0_3] : memref<1x128xf32, #tpu.memory_space<vmem>>, vector<1x128xf32>
    %4 = vector.broadcast %3 : vector<1x128xf32> to vector<128x128xf32>
    %5 = arith.mulf %2, %4 : vector<128x128xf32>
    %c0_4 = arith.constant 0 : index
    %c0_5 = arith.constant 0 : index
    %6 = vector.load %arg4[%c0_4, %c0_5] : memref<1x128xf32, #tpu.memory_space<vmem>>, vector<1x128xf32>
    %7 = vector.broadcast %6 : vector<1x128xf32> to vector<128x128xf32>
    %8 = arith.addf %5, %7 : vector<128x128xf32>
    %cst = arith.constant 0.000000e+00 : f32
    %9 = vector.broadcast %cst : f32 to vector<128x128xf32>
    %10 = arith.maximumf %8, %9 : vector<128x128xf32>
    %11 = tpu.transpose %10, [1, 0] : vector<128x128xf32> -> vector<128x128xf32>
    %12 = vector.extract_strided_slice %11 {offsets = [0, 0], sizes = [8, 128], strides = [1, 1]} : vector<128x128xf32> to vector<8x128xf32>
    %c0_6 = arith.constant 0 : index
    %c0_7 = arith.constant 0 : index
    %c0_8 = arith.constant 0 : index
    %13 = vector.load %arg5[%c0_6, %c0_7, %c0_8] : memref<1x8x128xf32, #tpu.memory_space<vmem>>, vector<1x8x128xf32>
    %14 = vector.shape_cast %13 : vector<1x8x128xf32> to vector<8x128xf32>
    %15 = vector.shape_cast %12 : vector<8x128xf32> to vector<1x8x128xf32>
    tpu.vector_store %arg5[%c0_6, %c0_7, %c0_8], %15 {strides = array<i32>} : memref<1x8x128xf32, #tpu.memory_space<vmem>>, vector<1x8x128xf32>,
    return
  }
  func.func @transform_0(%arg0: i32, %arg1: i32) -> (i32, i32, i32) {
    %c0_i32 = arith.constant 0 : i32
    %c0_i32_0 = arith.constant 0 : i32
    return %arg0, %arg1, %c0_i32 : i32, i32, i32
  }
  func.func @transform_1(%arg0: i32, %arg1: i32) -> (i32, i32) {
    %c0_i32 = arith.constant 0 : i32
    %c0_i32_0 = arith.constant 0 : i32
    %c0_i32_1 = arith.constant 0 : i32
    return %c0_i32, %c0_i32_0 : i32, i32
  }
  func.func @transform_2(%arg0: i32, %arg1: i32) -> (i32, i32) {
    %c0_i32 = arith.constant 0 : i32
    %c0_i32_0 = arith.constant 0 : i32
    %c0_i32_1 = arith.constant 0 : i32
    return %c0_i32, %c0_i32_0 : i32, i32
  }
  func.func @transform_3(%arg0: i32, %arg1: i32) -> (i32, i32, i32) {
    %c0_i32 = arith.constant 0 : i32
    %c0_i32_0 = arith.constant 0 : i32
    return %arg0, %c0_i32, %arg1 : i32, i32, i32
  }
}

module attributes {stable_mosaic.version = 11 : i64} {
  func.func @_conv_stats_kernel(%arg0: i32, %arg1: i32, %arg2: memref<1x18x18x4xbf16, #tpu.memory_space<vmem>>, %arg3: memref<36x128xbf16, #tpu.memory_space<vmem>>, %arg4: memref<1x128x128xbf16, #tpu.memory_space<vmem>>, %arg5: memref<1x1x2x128xf32, #tpu.memory_space<vmem>>, %arg6: memref<8x16x36xbf16, #tpu.memory_space<vmem>>) attributes {dimension_semantics = [#tpu.dimension_semantics<parallel>, #tpu.dimension_semantics<parallel>], iteration_bounds = array<i64: 2, 2>, scalar_prefetch = 0 : i64, scratch_operands = 1 : i64, tpu.core_type = #tpu.core_type<tc>, window_params = [{transform_indices = @transform_0, window_bounds = array<i64: 1, 18, 18, 4>}, {pipeline_mode = #tpu.pipeline_mode<synchronous>, transform_indices = @transform_1, window_bounds = array<i64: 36, 128>}, {transform_indices = @transform_2, window_bounds = array<i64: 1, 128, 128>}, {transform_indices = @transform_3, window_bounds = array<i64: 1, 1, 2, 128>}]} {
    %c8_i32 = arith.constant 8 : i32
    %0 = arith.muli %arg1, %c8_i32 : i32
    %1 = tpu.assume_multiple %0, 8 : i32
    %c0_i32 = arith.constant 0 : i32
    %2 = arith.addi %1, %c0_i32 : i32
    %c0 = arith.constant 0 : index
    %3 = arith.index_cast %2 : i32 to index
    %c0_0 = arith.constant 0 : index
    %c0_1 = arith.constant 0 : index
    %4 = vector.load %arg2[%c0, %3, %c0_0, %c0_1] : memref<1x18x18x4xbf16, #tpu.memory_space<vmem>>, vector<1x8x16x4xbf16>
    %5 = vector.shape_cast %4 : vector<1x8x16x4xbf16> to vector<8x16x4xbf16>
    %c0_2 = arith.constant 0 : index
    %c0_3 = arith.constant 0 : index
    %c0_4 = arith.constant 0 : index
    %6 = vector.load %arg6[%c0_2, %c0_3, %c0_4] : memref<8x16x36xbf16, #tpu.memory_space<vmem>>, vector<8x16x4xbf16>
    tpu.vector_store %arg6[%c0_2, %c0_3, %c0_4], %5 {strides = array<i32>} : memref<8x16x36xbf16, #tpu.memory_space<vmem>>, vector<8x16x4xbf16>,
    %c0_i32_5 = arith.constant 0 : i32
    %7 = arith.addi %1, %c0_i32_5 : i32
    %c0_6 = arith.constant 0 : index
    %8 = arith.index_cast %7 : i32 to index
    %c1 = arith.constant 1 : index
    %c0_7 = arith.constant 0 : index
    %9 = vector.load %arg2[%c0_6, %8, %c1, %c0_7] : memref<1x18x18x4xbf16, #tpu.memory_space<vmem>>, vector<1x8x16x4xbf16>
    %10 = vector.shape_cast %9 : vector<1x8x16x4xbf16> to vector<8x16x4xbf16>
    %c0_8 = arith.constant 0 : index
    %c0_9 = arith.constant 0 : index
    %c4 = arith.constant 4 : index
    %11 = vector.load %arg6[%c0_8, %c0_9, %c4] : memref<8x16x36xbf16, #tpu.memory_space<vmem>>, vector<8x16x4xbf16>
    tpu.vector_store %arg6[%c0_8, %c0_9, %c4], %10 {strides = array<i32>} : memref<8x16x36xbf16, #tpu.memory_space<vmem>>, vector<8x16x4xbf16>,
    %c0_i32_10 = arith.constant 0 : i32
    %12 = arith.addi %1, %c0_i32_10 : i32
    %c0_11 = arith.constant 0 : index
    %13 = arith.index_cast %12 : i32 to index
    %c2 = arith.constant 2 : index
    %c0_12 = arith.constant 0 : index
    %14 = vector.load %arg2[%c0_11, %13, %c2, %c0_12] : memref<1x18x18x4xbf16, #tpu.memory_space<vmem>>, vector<1x8x16x4xbf16>
    %15 = vector.shape_cast %14 : vector<1x8x16x4xbf16> to vector<8x16x4xbf16>
    %c0_13 = arith.constant 0 : index
    %c0_14 = arith.constant 0 : index
    %c8 = arith.constant 8 : index
    %16 = vector.load %arg6[%c0_13, %c0_14, %c8] : memref<8x16x36xbf16, #tpu.memory_space<vmem>>, vector<8x16x4xbf16>
    tpu.vector_store %arg6[%c0_13, %c0_14, %c8], %15 {strides = array<i32>} : memref<8x16x36xbf16, #tpu.memory_space<vmem>>, vector<8x16x4xbf16>,
    %c1_i32 = arith.constant 1 : i32
    %17 = arith.addi %1, %c1_i32 : i32
    %c0_15 = arith.constant 0 : index
    %18 = arith.index_cast %17 : i32 to index
    %c0_16 = arith.constant 0 : index
    %c0_17 = arith.constant 0 : index
    %19 = vector.load %arg2[%c0_15, %18, %c0_16, %c0_17] : memref<1x18x18x4xbf16, #tpu.memory_space<vmem>>, vector<1x8x16x4xbf16>
    %20 = vector.shape_cast %19 : vector<1x8x16x4xbf16> to vector<8x16x4xbf16>
    %c0_18 = arith.constant 0 : index
    %c0_19 = arith.constant 0 : index
    %c12 = arith.constant 12 : index
    %21 = vector.load %arg6[%c0_18, %c0_19, %c12] : memref<8x16x36xbf16, #tpu.memory_space<vmem>>, vector<8x16x4xbf16>
    tpu.vector_store %arg6[%c0_18, %c0_19, %c12], %20 {strides = array<i32>} : memref<8x16x36xbf16, #tpu.memory_space<vmem>>, vector<8x16x4xbf16>,
    %c1_i32_20 = arith.constant 1 : i32
    %22 = arith.addi %1, %c1_i32_20 : i32
    %c0_21 = arith.constant 0 : index
    %23 = arith.index_cast %22 : i32 to index
    %c1_22 = arith.constant 1 : index
    %c0_23 = arith.constant 0 : index
    %24 = vector.load %arg2[%c0_21, %23, %c1_22, %c0_23] : memref<1x18x18x4xbf16, #tpu.memory_space<vmem>>, vector<1x8x16x4xbf16>
    %25 = vector.shape_cast %24 : vector<1x8x16x4xbf16> to vector<8x16x4xbf16>
    %c0_24 = arith.constant 0 : index
    %c0_25 = arith.constant 0 : index
    %c16 = arith.constant 16 : index
    %26 = vector.load %arg6[%c0_24, %c0_25, %c16] : memref<8x16x36xbf16, #tpu.memory_space<vmem>>, vector<8x16x4xbf16>
    tpu.vector_store %arg6[%c0_24, %c0_25, %c16], %25 {strides = array<i32>} : memref<8x16x36xbf16, #tpu.memory_space<vmem>>, vector<8x16x4xbf16>,
    %c1_i32_26 = arith.constant 1 : i32
    %27 = arith.addi %1, %c1_i32_26 : i32
    %c0_27 = arith.constant 0 : index
    %28 = arith.index_cast %27 : i32 to index
    %c2_28 = arith.constant 2 : index
    %c0_29 = arith.constant 0 : index
    %29 = vector.load %arg2[%c0_27, %28, %c2_28, %c0_29] : memref<1x18x18x4xbf16, #tpu.memory_space<vmem>>, vector<1x8x16x4xbf16>
    %30 = vector.shape_cast %29 : vector<1x8x16x4xbf16> to vector<8x16x4xbf16>
    %c0_30 = arith.constant 0 : index
    %c0_31 = arith.constant 0 : index
    %c20 = arith.constant 20 : index
    %31 = vector.load %arg6[%c0_30, %c0_31, %c20] : memref<8x16x36xbf16, #tpu.memory_space<vmem>>, vector<8x16x4xbf16>
    tpu.vector_store %arg6[%c0_30, %c0_31, %c20], %30 {strides = array<i32>} : memref<8x16x36xbf16, #tpu.memory_space<vmem>>, vector<8x16x4xbf16>,
    %c2_i32 = arith.constant 2 : i32
    %32 = arith.addi %1, %c2_i32 : i32
    %c0_32 = arith.constant 0 : index
    %33 = arith.index_cast %32 : i32 to index
    %c0_33 = arith.constant 0 : index
    %c0_34 = arith.constant 0 : index
    %34 = vector.load %arg2[%c0_32, %33, %c0_33, %c0_34] : memref<1x18x18x4xbf16, #tpu.memory_space<vmem>>, vector<1x8x16x4xbf16>
    %35 = vector.shape_cast %34 : vector<1x8x16x4xbf16> to vector<8x16x4xbf16>
    %c0_35 = arith.constant 0 : index
    %c0_36 = arith.constant 0 : index
    %c24 = arith.constant 24 : index
    %36 = vector.load %arg6[%c0_35, %c0_36, %c24] : memref<8x16x36xbf16, #tpu.memory_space<vmem>>, vector<8x16x4xbf16>
    tpu.vector_store %arg6[%c0_35, %c0_36, %c24], %35 {strides = array<i32>} : memref<8x16x36xbf16, #tpu.memory_space<vmem>>, vector<8x16x4xbf16>,
    %c2_i32_37 = arith.constant 2 : i32
    %37 = arith.addi %1, %c2_i32_37 : i32
    %c0_38 = arith.constant 0 : index
    %38 = arith.index_cast %37 : i32 to index
    %c1_39 = arith.constant 1 : index
    %c0_40 = arith.constant 0 : index
    %39 = vector.load %arg2[%c0_38, %38, %c1_39, %c0_40] : memref<1x18x18x4xbf16, #tpu.memory_space<vmem>>, vector<1x8x16x4xbf16>
    %40 = vector.shape_cast %39 : vector<1x8x16x4xbf16> to vector<8x16x4xbf16>
    %c0_41 = arith.constant 0 : index
    %c0_42 = arith.constant 0 : index
    %c28 = arith.constant 28 : index
    %41 = vector.load %arg6[%c0_41, %c0_42, %c28] : memref<8x16x36xbf16, #tpu.memory_space<vmem>>, vector<8x16x4xbf16>
    tpu.vector_store %arg6[%c0_41, %c0_42, %c28], %40 {strides = array<i32>} : memref<8x16x36xbf16, #tpu.memory_space<vmem>>, vector<8x16x4xbf16>,
    %c2_i32_43 = arith.constant 2 : i32
    %42 = arith.addi %1, %c2_i32_43 : i32
    %c0_44 = arith.constant 0 : index
    %43 = arith.index_cast %42 : i32 to index
    %c2_45 = arith.constant 2 : index
    %c0_46 = arith.constant 0 : index
    %44 = vector.load %arg2[%c0_44, %43, %c2_45, %c0_46] : memref<1x18x18x4xbf16, #tpu.memory_space<vmem>>, vector<1x8x16x4xbf16>
    %45 = vector.shape_cast %44 : vector<1x8x16x4xbf16> to vector<8x16x4xbf16>
    %c0_47 = arith.constant 0 : index
    %c0_48 = arith.constant 0 : index
    %c32 = arith.constant 32 : index
    %46 = vector.load %arg6[%c0_47, %c0_48, %c32] : memref<8x16x36xbf16, #tpu.memory_space<vmem>>, vector<8x16x4xbf16>
    tpu.vector_store %arg6[%c0_47, %c0_48, %c32], %45 {strides = array<i32>} : memref<8x16x36xbf16, #tpu.memory_space<vmem>>, vector<8x16x4xbf16>,
    %c0_49 = arith.constant 0 : index
    %c0_50 = arith.constant 0 : index
    %c0_51 = arith.constant 0 : index
    %47 = vector.load %arg6[%c0_49, %c0_50, %c0_51] : memref<8x16x36xbf16, #tpu.memory_space<vmem>>, vector<8x16x36xbf16>
    %48 = vector.shape_cast %47 : vector<8x16x36xbf16> to vector<128x36xbf16>
    %c0_52 = arith.constant 0 : index
    %c0_53 = arith.constant 0 : index
    %49 = vector.load %arg3[%c0_52, %c0_53] : memref<36x128xbf16, #tpu.memory_space<vmem>>, vector<36x128xbf16>
    %cst = arith.constant dense<0.000000e+00> : vector<128x128xf32>
    %50 = tpu.matmul %48, %49, %cst {dimension_numbers = #tpu.dot_dimension_numbers<[1], [0], [0], [1], [0, 0, 1, 1], [], []>} : vector<128x36xbf16>, vector<36x128xbf16>, vector<128x128xf32> -> vector<128x128xf32>
    %51 = arith.truncf %50 : vector<128x128xf32> to vector<128x128xbf16>
    %c0_54 = arith.constant 0 : index
    %c0_55 = arith.constant 0 : index
    %c0_56 = arith.constant 0 : index
    %52 = vector.load %arg4[%c0_54, %c0_55, %c0_56] : memref<1x128x128xbf16, #tpu.memory_space<vmem>>, vector<1x128x128xbf16>
    %53 = vector.shape_cast %52 : vector<1x128x128xbf16> to vector<128x128xbf16>
    %54 = vector.shape_cast %51 : vector<128x128xbf16> to vector<1x128x128xbf16>
    tpu.vector_store %arg4[%c0_54, %c0_55, %c0_56], %54 {strides = array<i32>} : memref<1x128x128xbf16, #tpu.memory_space<vmem>>, vector<1x128x128xbf16>,
    %cst_57 = arith.constant dense<0.000000e+00> : vector<128xf32>
    %55 = vector.multi_reduction <add>, %50, %cst_57 [0] : vector<128x128xf32> to vector<128xf32>
    %56 = vector.shape_cast %55 : vector<128xf32> to vector<1x128xf32>
    %57 = arith.mulf %50, %50 : vector<128x128xf32>
    %cst_58 = arith.constant dense<0.000000e+00> : vector<128xf32>
    %58 = vector.multi_reduction <add>, %57, %cst_58 [0] : vector<128x128xf32> to vector<128xf32>
    %59 = vector.shape_cast %58 : vector<128xf32> to vector<1x128xf32>
    %60 = tpu.concatenate %56, %59 in 0 : vector<1x128xf32>, vector<1x128xf32> -> vector<2x128xf32>
    %c0_59 = arith.constant 0 : index
    %c0_60 = arith.constant 0 : index
    %c0_61 = arith.constant 0 : index
    %c0_62 = arith.constant 0 : index
    %61 = vector.load %arg5[%c0_59, %c0_60, %c0_61, %c0_62] : memref<1x1x2x128xf32, #tpu.memory_space<vmem>>, vector<1x1x2x128xf32>
    %62 = vector.shape_cast %61 : vector<1x1x2x128xf32> to vector<2x128xf32>
    %63 = vector.shape_cast %60 : vector<2x128xf32> to vector<1x1x2x128xf32>
    tpu.vector_store %arg5[%c0_59, %c0_60, %c0_61, %c0_62], %63 {strides = array<i32>} : memref<1x1x2x128xf32, #tpu.memory_space<vmem>>, vector<1x1x2x128xf32>,
    return
  }
  func.func @transform_0(%arg0: i32, %arg1: i32) -> (i32, i32, i32, i32) {
    %c0_i32 = arith.constant 0 : i32
    %c0_i32_0 = arith.constant 0 : i32
    %c0_i32_1 = arith.constant 0 : i32
    %c0_i32_2 = arith.constant 0 : i32
    return %arg0, %c0_i32, %c0_i32_0, %c0_i32_1 : i32, i32, i32, i32
  }
  func.func @transform_1(%arg0: i32, %arg1: i32) -> (i32, i32) {
    %c0_i32 = arith.constant 0 : i32
    %c0_i32_0 = arith.constant 0 : i32
    %c0_i32_1 = arith.constant 0 : i32
    return %c0_i32, %c0_i32_0 : i32, i32
  }
  func.func @transform_2(%arg0: i32, %arg1: i32) -> (i32, i32, i32) {
    %c0_i32 = arith.constant 0 : i32
    %c0_i32_0 = arith.constant 0 : i32
    return %arg0, %arg1, %c0_i32 : i32, i32, i32
  }
  func.func @transform_3(%arg0: i32, %arg1: i32) -> (i32, i32, i32, i32) {
    %c0_i32 = arith.constant 0 : i32
    %c0_i32_0 = arith.constant 0 : i32
    %c0_i32_1 = arith.constant 0 : i32
    return %arg0, %arg1, %c0_i32, %c0_i32_0 : i32, i32, i32, i32
  }
}

</mosaic_0001>

<bundles_post_ra>
// kernel: crb_forward.3
= control target key start
LH: loop header
LB: loop body
LE: loop exit
PB: predicated region body
PF: predicated region fallthrough
CT: control target
= control target key end

     0   :  { %s573_s12 = smov 0   ;;  %s575_s13 = smov 0   ;;  %s685_s0 = inlined_call_operand.vmem [shape: bf16[2,256,128], index: 0, kind: input, shape index: {}]   ;;  %s686_s1 = inlined_call_operand.vmem [shape: f32[1,128], index: 1, kind: input, shape index: {}]   ;;  %s687_s2 = inlined_call_operand.vmem [shape: f32[1,128], index: 2, kind: input, shape index: {}]   ;;  %s688_s3 = inlined_call_operand.vmem [shape: f32[2,8,256], index: 3, kind: output, shape index: {}]  }
   0x1   :  { %s577_s14 = smov 0   ;;  %s579_s15 = smov 0  }
   0x2   :  { %s581_s16 = smov 0  }
   0x3 LB: > { %s22_s17 = sadd.s32 1, %s543_s14  ;;  %s25_s18 = sadd.s32 1, %s547_s15  ;;  %s551_s16 = sphi %s581_s16, %s13_s16   ;;  %s547_s15 = sphi %s579_s15, %s692_s15   ;;  %s543_s14 = sphi %s577_s14, %s691_s14   ;;  %s539_s13 = sphi %s575_s13, %s690_s13   ;;  %s535_s12 = sphi %s573_s12, %s689_s12  }
   0x4   : > { %p23_p0 = scmp.ge.s32.totalorder %s22_s17, 2  ;;  %p424_p1 = scmp.ge.s32.totalorder %s551_s16, 1 }
   0x5   : > { %p158_p2 = scmp.lt.s32.totalorder %s551_s16, 5 }
   0x6   : > { %s694_s17 = smov (%p23_p0, %s22_s17), 0  ;;  %s696_s18 = smov (!%p23_p0, %s25_s18), %s547_s15 }
   0x7   : > { %p159_p3 = pnand %p424_p1, %p158_p2  ;;  %p27_p4 = scmp.ge.s32.totalorder %s696_s18, 2 }
   0x8   : > { %s425_s19 = sshll.u32 (!%p159_p3), %s535_s12, 4  ;;  %p190_p5 = scmp.lt.s32.totalorder (!%p159_p3), %s539_s13, 1  ;;  %v618_v1 = vld [vmem:[%s686_s1] ss:$0 sm:$0xff] (!%p159_p3) }
   0x9   : > { %s698_s18 = smov (%p27_p4, %s696_s18), 0  ;;  %162 = sbr.rel (%p159_p3) target bundleno = 160 (0xa0), region = 32 }
   0xa   : > { %p192_p6 = scmp.lt.s32.totalorder (!%p159_p3), %s425_s19, 31  ;;  %v624_v6 = vld [vmem:[%s687_s2] ss:$0 sm:$0xff] (!%p159_p3)  ;;  %p201_p7 = scmp.lt.s32.totalorder (!%p159_p3), %s535_s12, 1 }
  0x10   : > { %s700_s13 = smov (!%p190_p5, %s539_s13), 1  ;;  %s702_s19 = smov (!%p192_p6, %s425_s19), 31 }
  0x11   : > { %s426_s20 = sshll.u32 %s700_s13, 5  ;;  %s704_s12 = smov (!%p201_p7, %s535_s12), 1 }
  0x12   : > { %s195_s21 = sadd.s32 %s426_s20, %s702_s19  ;;  %s428_s30 = sshll.u32 %s700_s13, 1 }
  0x13   : > { %s427_s22 = sshll.u32 %s195_s21, 2  ;;  %s204_s4 = sadd.s32 %s428_s30, %s704_s12 }
  0x14   : > { %s612_s25 = scalar_lea.vmem %s685_s0, %s427_s22  ;;  %s429_s5 = sshll.u32 %s204_s4, 3 }
  0x15   : > { %v435_v0 = vld [vmem:[%s612_s25] sm:$0xff]   ;;  %v466_v2 = vld [vmem:[%s612_s25 + $0x8] sm:$0xff]   ;;  %v467_v13 = vld [vmem:[%s612_s25 + $0x10] sm:$0xff]   ;;  %s206_s8 = scalar_lea.vmem %s688_s3, %s429_s5 }
  0x16   : > { %v436_v3 = vunpack.c.l.bf16 %v435_v0  ;;  %v437_v4 = vunpack.c.h.bf16 %v435_v0  ;;  %v440_v5 = vunpack.c.l.bf16 %v466_v2  ;;  %v441_v12 = vunpack.c.h.bf16 %v466_v2  ;;  %v468_v23 = vld [vmem:[%s612_s25 + $0x18] sm:$0xff]   ;;  %v469_v32 = vld [vmem:[%s612_s25 + $0x20] sm:$0xff]   ;;  %v470_v41 = vld [vmem:[%s612_s25 + $0x28] sm:$0xff]  }
  0x17   : > { %v444_v18 = vunpack.c.l.bf16 %v467_v13  ;;  %v445_v22 = vunpack.c.h.bf16 %v467_v13  ;;  %v448_v27 = vunpack.c.l.bf16 %v468_v23  ;;  %v449_v31 = vunpack.c.h.bf16 %v468_v23  ;;  %v471_v50 = vld [vmem:[%s612_s25 + $0x30] sm:$0xff]   ;;  %v472_v59 = vld [vmem:[%s612_s25 + $0x38] sm:$0xff]  }
  0x18   : > { %v246_v7 = vmul.f32 %v436_v3, %v618_v1  ;;  %v247_v8 = vmul.f32 %v437_v4, %v618_v1  ;;  %v248_v11 = vmul.f32 %v440_v5, %v618_v1  ;;  %v249_v17 = vmul.f32 %v441_v12, %v618_v1 }
  0x19   : > { %v250_v21 = vmul.f32 %v444_v18, %v618_v1  ;;  %v251_v26 = vmul.f32 %v445_v22, %v618_v1  ;;  %v252_v30 = vmul.f32 %v448_v27, %v618_v1  ;;  %v253_v35 = vmul.f32 %v449_v31, %v618_v1 }
  0x1a   : > { %v269_v9 = vadd.f32 %v624_v6, %v246_v7  ;;  %v270_v10 = vadd.f32 %v624_v6, %v247_v8  ;;  %v271_v16 = vadd.f32 %v624_v6, %v248_v11  ;;  %v272_v20 = vadd.f32 %v624_v6, %v249_v17 }
  0x1b   : > { %v273_v25 = vadd.f32 %v624_v6, %v250_v21  ;;  %v274_v29 = vadd.f32 %v624_v6, %v251_v26  ;;  %v275_v34 = vadd.f32 %v624_v6, %v252_v30  ;;  %v452_v36 = vunpack.c.l.bf16 %v469_v32 }
  0x1c   : > { %v285_v14 = vmax.f32 %v269_v9, 0.0  ;;  %v286_v15 = vmax.f32 %v270_v10, 0.0  ;;  %v287_v19 = vmax.f32 %v271_v16, 0.0  ;;  %v288_v24 = vmax.f32 %v272_v20, 0.0 }
  0x1d   : > { %v289_v28 = vmax.f32 %v273_v25, 0.0  ;;  %v290_v33 = vmax.f32 %v274_v29, 0.0  ;;  %v291_v37 = vmax.f32 %v275_v34, 0.0  ;;  %v276_v38 = vadd.f32 %v624_v6, %v253_v35 }
  0x1e   : > { %301 = vxpose.xlu0.b32.start [1/16] (narrow) %v285_v14, 8  ;;  %v254_v39 = vmul.f32 %v452_v36, %v618_v1  ;;  %v453_v40 = vunpack.c.h.bf16 %v469_v32  ;;  %v456_v45 = vunpack.c.l.bf16 %v470_v41  ;;  %v457_v49 = vunpack.c.h.bf16 %v470_v41 }
  0x1f   : > { %v292_v42 = vmax.f32 %v276_v38, 0.0  ;;  %v460_v54 = vunpack.c.l.bf16 %v471_v50  ;;  %v461_v58 = vunpack.c.h.bf16 %v471_v50  ;;  %v464_v63 = vunpack.c.l.bf16 %v472_v59 }
  0x20   : > { %v277_v43 = vadd.f32 %v624_v6, %v254_v39  ;;  %v255_v44 = vmul.f32 %v453_v40, %v618_v1  ;;  %v256_v48 = vmul.f32 %v456_v45, %v618_v1  ;;  %v257_v53 = vmul.f32 %v457_v49, %v618_v1 }
  0x21   : > { %v258_v57 = vmul.f32 %v460_v54, %v618_v1  ;;  %v259_v62 = vmul.f32 %v461_v58, %v618_v1  ;;  %v260_v3 = vmul.f32 %v464_v63, %v618_v1  ;;  %v465_v4 = vunpack.c.h.bf16 %v472_v59 }
  0x22   : > { %302 = vxpose.xlu0.b32.cont [2/16] (narrow) %v286_v15, 8  ;;  %v293_v46 = vmax.f32 %v277_v43, 0.0  ;;  %v278_v47 = vadd.f32 %v624_v6, %v255_v44  ;;  %v279_v52 = vadd.f32 %v624_v6, %v256_v48  ;;  %v280_v56 = vadd.f32 %v624_v6, %v257_v53 }
  0x23   : > { %v281_v61 = vadd.f32 %v624_v6, %v258_v57  ;;  %v282_v2 = vadd.f32 %v624_v6, %v259_v62  ;;  %v283_v7 = vadd.f32 %v624_v6, %v260_v3  ;;  %v261_v8 = vmul.f32 %v465_v4, %v618_v1 }
  0x24   : > { %v294_v51 = vmax.f32 %v278_v47, 0.0  ;;  %v295_v55 = vmax.f32 %v279_v52, 0.0  ;;  %v296_v60 = vmax.f32 %v280_v56, 0.0 }
  0x25   : > { %v297_v0 = vmax.f32 %v281_v61, 0.0  ;;  %v298_v5 = vmax.f32 %v282_v2, 0.0  ;;  %v299_v9 = vmax.f32 %v283_v7, 0.0  ;;  %v284_v10 = vadd.f32 %v624_v6, %v261_v8 }
  0x26   : > { %303 = vxpose.xlu0.b32.cont [3/16] (narrow) %v287_v19, 8 }
  0x27   : > { %v300_v11 = vmax.f32 %v284_v10, 0.0 }
  0x2a   : > { %304 = vxpose.xlu0.b32.cont [4/16] (narrow) %v288_v24, 8 }
  0x2e   : > { %305 = vxpose.xlu0.b32.cont [5/16] (narrow) %v289_v28, 8 }
  0x32   : > { %306 = vxpose.xlu0.b32.cont [6/16] (narrow) %v290_v33, 8 }
  0x36   : > { %307 = vxpose.xlu0.b32.cont [7/16] (narrow) %v291_v37, 8 }
  0x3a   : > { %308 = vxpose.xlu0.b32.cont [8/16] (narrow) %v292_v42, 8 }
  0x3e   : > { %309 = vxpose.xlu0.b32.cont [9/16] (narrow) %v293_v46, 8 }
  0x42   : > { %310 = vxpose.xlu0.b32.cont [10/16] (narrow) %v294_v51, 8 }
  0x46   : > { %311 = vxpose.xlu0.b32.cont [11/16] (narrow) %v295_v55, 8 }
  0x4a   : > { %312 = vxpose.xlu0.b32.cont [12/16] (narrow) %v296_v60, 8 }
  0x4e   : > { %313 = vxpose.xlu0.b32.cont [13/16] (narrow) %v297_v0, 8 }
  0x52   : > { %314 = vxpose.xlu0.b32.cont [14/16] (narrow) %v298_v5, 8 }
  0x56   : > { %315 = vxpose.xlu0.b32.cont [15/16] (narrow) %v299_v9, 8 }
  0x5a   : > { %316 = vxpose.xlu0.b32.end [16/16] (narrow) %v300_v11, 8 }
  0x9e   : > { %v317_v12 = vpop.trf.xlu0 }
  0x9f   : > { %333 = vst [vmem:[%s206_s8] sm:$0xff] %v317_v12 }
  0xa0 PF: > { %s13_s16 = sadd.s32 1, %s551_s16   ;;  %s689_s12 = smov %s543_s14 }
  0xa1   : > { %p10_p8 = scmp.ge.s32.totalorder %s13_s16, 6   ;;  %s690_s13 = smov %s547_s15 }
  0xa2   : > { %s691_s14 = smov %s694_s17  ;;  %s692_s15 = smov %s698_s18 }
  0xa3   :  { %12 = sbr.rel (!%p10_p8) target bundleno = 3 (0x3), region = 62 }

// kernel: crb_forward.2
= control target key start
LH: loop header
LB: loop body
LE: loop exit
PB: predicated region body
PF: predicated region fallthrough
CT: control target
= control target key end

     0   :  { %s2643_s12 = smov 0   ;;  %s2645_s13 = smov 0   ;;  %s3053_s0 = inlined_call_operand.vmem [shape: bf16[2,18,18,4], index: 0, kind: input, shape index: {}]   ;;  %s3054_s1 = inlined_call_operand.vmem [shape: bf16[36,128], index: 1, kind: input, shape index: {}]   ;;  %s3055_s2 = inlined_call_operand.vmem [shape: bf16[2,256,128], index: 2, kind: output, shape index: {0}]   ;;  %s3056_s3 = inlined_call_operand.vmem [shape: f32[2,2,2,128], index: 3, kind: output, shape index: {1}]  }
   0x1   :  { %s2647_s14 = smov 0   ;;  %s2649_s15 = smov 0  }
   0x2   :  { %s2651_s16 = smov 0  }
   0x3 LB: > { %s23_s17 = sadd.s32 1, %s2605_s14  ;;  %s26_s18 = sadd.s32 1, %s2609_s15  ;;  %s2613_s16 = sphi %s2651_s16, %s14_s16   ;;  %s2609_s15 = sphi %s2649_s15, %s3060_s15   ;;  %s2605_s14 = sphi %s2647_s14, %s3059_s14   ;;  %s2601_s13 = sphi %s2645_s13, %s3058_s13   ;;  %s2597_s12 = sphi %s2643_s12, %s3057_s12  }
   0x4   : > { %p24_p0 = scmp.ge.s32.totalorder %s23_s17, 2  ;;  %p2007_p1 = scmp.ge.s32.totalorder %s2613_s16, 1 }
   0x5   : > { %p156_p2 = scmp.lt.s32.totalorder %s2613_s16, 5 }
   0x6   : > { %s3062_s17 = smov (%p24_p0, %s23_s17), 0  ;;  %s3064_s18 = smov (!%p24_p0, %s26_s18), %s2609_s15 }
   0x7   : > { %p157_p3 = pnand %p2007_p1, %p156_p2  ;;  %p28_p4 = scmp.ge.s32.totalorder %s3064_s18, 2 }
   0x8   : > { %p192_p5 = scmp.lt.s32.totalorder (!%p157_p3), %s2601_s13, 1  ;;  %s2298_s19 = smul.u32 (!%p157_p3), 96, %s2597_s12  ;;  %vm599_vm0 = vcmask (!%p157_p3), 1046528   ;;  %vm381_vm1 = vsmask.f32 (!%p157_p3), 7424  ;;  %vm284_vm2 = vcmask (!%p157_p3), 31744  }
   0x9   : > { %s3066_s18 = smov (%p28_p4, %s3064_s18), 0  ;;  %160 = sbr.rel (%p157_p3) target bundleno = 509 (0x1fd), region = 28 }
   0xa   : > { %s2615_s25 = smov (!%p157_p3), 12   ;;  %s2616_s26 = smov (!%p157_p3), 20   ;;  %vm502_vm3 = vcmask (!%p157_p3), 64544   ;;  %vm648_vm4 = vcmask (!%p157_p3), 97344   ;;  %vm741_vm5 = vcmask (!%p157_p3), 130144   ;;  %vm1620_vm6 = vcmask (!%p157_p3), 1041408  }
   0xb   : > { %s2617_s27 = smov (!%p157_p3), 8   ;;  %s2618_s28 = smov (!%p157_p3), 4   ;;  %vm958_vm7 = vcmask (!%p157_p3), 162944   ;;  %vm1103_vm8 = vcmask (!%p157_p3), 195744   ;;  %vm1196_vm9 = vcmask (!%p157_p3), 228544   ;;  %vm1413_vm10 = vcmask (!%p157_p3), 261344  }
   0xc   : > { %s2619_s29 = smov (!%p157_p3), 16   ;;  %s2620_s30 = smov (!%p157_p3), 24   ;;  %vm1558_vm11 = vcmask (!%p157_p3), 294144   ;;  %vm1595_vm12 = vcmask (!%p157_p3), 293888   ;;  %vm1859_vm13 = vcmask (!%p157_p3), 1040384  }
   0xd   : > { %s2621_s4 = smov (!%p157_p3), 28   ;;  %s2622_s5 = smov (!%p157_p3), 32  }
   0xe   : > { %p209_p7 = scmp.lt.s32.totalorder (!%p157_p3), %s2597_s12, 1 }
  0x10   : > { %s3068_s13 = smov (!%p192_p5, %s2601_s13), 1 }
  0x11   : > { %s2403_s20 = smul.u32 216, %s3068_s13 }
  0x13   : > { %s196_s23 = scalar_lea.vmem %s3053_s0, %s2403_s20  ;;  %s2010_s20 = sshll.u32 %s3068_s13, 5 }
  0x14   : > { %s2682_s24 = scalar_lea.vmem %s196_s23, %s2298_s19  ;;  %s2009_s19 = sshll.u32 %s2597_s12, 4 }
  0x15   : > { %v2452_v0 = vld [vmem:[%s2682_s24 + $0x18] sm:$0xff]   ;;  %v2453_v1 = vld [vmem:[%s2682_s24 + $0xc] sm:$0xff]   ;;  %v2455_v3 = vld [vmem:[%s2682_s24 + $0x14] ss:$0 sps:$4 sm:$0x11]   ;;  %p200_p6 = scmp.lt.s32.totalorder %s2009_s19, 31 }
  0x16   : > { %719 = vrot.lane.b32.xlu1 %v2452_v0, %s2615_s25  ;;  %717 = vrot.lane.b32.xlu0 %v2453_v1, %s2615_s25  ;;  %v2454_v2 = vld [vmem:[%s2682_s24 + $0xc] sm:$0xfe]   ;;  %v2460_v4 = vld [vmem:[%s2682_s24] sm:$0xff]   ;;  %v1056_v6 = vrot.slane %v2455_v3, 1  ;;  %s3072_s12 = smov (!%p209_p7, %s2597_s12), 1 }
  0x17   : > { %v1055_v5 = vrot.slane %v2454_v2, 1  ;;  %v2456_v7 = vld [vmem:[%s2682_s24] sm:$0xfe]   ;;  %v2457_v8 = vld [vmem:[%s2682_s24 + $0x8] ss:$0 sps:$4 sm:$0x11]  }
  0x18   : > { %v383_v9 = vshrl.u32 %v2460_v4, 16  ;;  %v600_v11 = vrot.slane %v2456_v7, 1  ;;  %v2458_v12 = vld [vmem:[%s2682_s24 + $0xc] sm:$0xfe]   ;;  %v385_v13 = vshll.u32 %v2460_v4, 16  ;;  %v601_v14 = vrot.slane %v2457_v8, 1 }
  0x19   : > { %v1057_v10 = vsel %vm599_vm0, %v1055_v5, %v1056_v6  ;;  %v2459_v15 = vld [vmem:[%s2682_s24 + $0x14] ss:$0 sps:$4 sm:$0x11]   ;;  %v603_v16 = vrot.slane %v2458_v12, 1  ;;  %v2462_v21 = vld [vmem:[%s2682_s24 + $0x18] sm:$0xfe]  }
  0x1a   : > { %1079 = vrot.lane.b32.xlu0 %v1057_v10, %s2616_s26  ;;  %v387_v17 = vrot.slane %v385_v13, 1  ;;  %v602_v18 = vsel %vm599_vm0, %v600_v11, %v601_v14  ;;  %v604_v19 = vrot.slane %v2459_v15, 1  ;;  %v2461_v20 = vld [vmem:[%s2682_s24 + $0x8] ss:$0 sps:$4 sm:$0x11]   ;;  %v1058_v26 = vrot.slane %v2462_v21, 1 }
  0x1b   : > { %624 = vrot.lane.b32.xlu1 %v602_v18, %s2617_s27  ;;  %v390_v24 = vshll.u32 %v2461_v20, 16  ;;  %v2463_v25 = vld [vmem:[%s2682_s24 + $0x20] ss:$0 sps:$4 sm:$0x11]   ;;  %v2464_v27 = vld [vmem:[%s2682_s24 + $0xc] sm:$0xff]   ;;  %v2466_v31 = vld [vmem:[%s2682_s24 + $0x18] sm:$0xff]  }
  0x1c   : > { %v605_v22 = vsel %vm599_vm0, %v603_v16, %v604_v19  ;;  %v388_v23 = vor.u32 %v387_v17, %v383_v9  ;;  %v1059_v29 = vrot.slane %v2463_v25, 1  ;;  %v2465_v30 = vld [vmem:[%s2682_s24 + $0x14] ss:$0 sps:$4 sm:$0x11]   ;;  %v395_v32 = vshrl.u32 %v2464_v27, 16  ;;  %v2468_v41 = vld [vmem:[%s2682_s24 + $0xc] sm:$0xff]  }
  0x1d   : > { %v392_v28 = vrot.slane %v390_v24, 1  ;;  %v397_v33 = vshll.u32 %v2464_v27, 16  ;;  %v402_v36 = vshll.u32 %v2465_v30, 16  ;;  %v2467_v37 = vld [vmem:[%s2682_s24 + $0x20] ss:$0 sps:$4 sm:$0x11]  }
  0x1e   : > { %v1060_v35 = vsel %vm599_vm0, %v1058_v26, %v1059_v29  ;;  %v851_v39 = vshrl.u32 %v2466_v31, 16  ;;  %v853_v40 = vshll.u32 %v2466_v31, 16  ;;  %v858_v43 = vshll.u32 %v2467_v37, 16  ;;  %v2469_v46 = vld [vmem:[%s2682_s24 + $0x14] ss:$0 sps:$4 sm:$0x11]  }
  0x1f   : > { %626 = vrot.lane.b32.xlu1 %v605_v22, %s2617_s27  ;;  %v393_v34 = vsel %vm381_vm1, %v388_v23, %v392_v28  ;;  %v399_v38 = vrot.slane %v397_v33, 1  ;;  %v404_v42 = vrot.slane %v402_v36, 1  ;;  %v839_v47 = vshrl.u32 %v2468_v41, 16  ;;  %v2471_v54 = vld [vmem:[%s2682_s24 + $0x24] sm:$0xff]   ;;  %v2472_v58 = vld [vmem:[%s2682_s24 + $0x18] sm:$0xff]   ;;  %s3070_s19 = smov (!%p200_p6, %s2009_s19), 31 }
  0x20   : > { %478 = vrot.lane.b32.xlu0 %v393_v34, %s2618_s28  ;;  %v855_v45 = vrot.slane %v853_v40, 1  ;;  %v841_v48 = vshll.u32 %v2468_v41, 16  ;;  %v860_v49 = vrot.slane %v858_v43, 1  ;;  %v846_v53 = vshll.u32 %v2469_v46, 16  ;;  %v2470_v59 = vld [vmem:[%s2682_s24 + $0x18] sm:$0xff]   ;;  %v2474_v61 = vld [vmem:[%s2682_s24 + $0x24] sm:$0xff]   ;;  %s203_s21 = sadd.s32 %s2010_s20, %s3070_s19 }
  0x21   : > { %v400_v44 = vor.u32 %v399_v38, %v395_v32  ;;  %v2473_v60 = vld [vmem:[%s2682_s24 + $0x20] ss:$0 sps:$4 sm:$0x11]   ;;  %v1294_v63 = vshrl.u32 %v2472_v58, 16  ;;  %v1296_v0 = vshll.u32 %v2472_v58, 16  ;;  %v1306_v3 = vshrl.u32 %v2474_v61, 16 }
  0x22   : > { %v856_v51 = vor.u32 %v855_v45, %v851_v39  ;;  %v843_v52 = vrot.slane %v841_v48, 1  ;;  %v848_v57 = vrot.slane %v846_v53, 1  ;;  %v1301_v1 = vshll.u32 %v2473_v60, 16  ;;  %v2475_v2 = vld [vmem:[%s2682_s24 + $0x2c] ss:$0 sps:$4 sm:$0x11]  }
  0x23   : > { %1081 = vrot.lane.b32.xlu1 %v1060_v35, %s2616_s26  ;;  %v405_v50 = vsel %vm381_vm1, %v400_v44, %v404_v42  ;;  %v1308_v4 = vshll.u32 %v2474_v61, 16  ;;  %v1298_v5 = vrot.slane %v1296_v0, 1  ;;  %v2478_v6 = vld [vmem:[%s2682_s24 + $0x18] sm:$0xff]   ;;  %v1313_v9 = vshll.u32 %v2475_v2, 16  ;;  %v2482_v11 = vld [vmem:[%s2682_s24 + $0x24] sm:$0xff]   ;;  %v2489_v58 = vld [vmem:[%s2682_s24 + $0x30] sm:$0xff]  }
  0x24   : > { %480 = vrot.lane.b32.xlu0 %v405_v50, %s2618_s28  ;;  %v861_v55 = vsel %vm381_vm1, %v856_v51, %v860_v49  ;;  %v844_v56 = vor.u32 %v843_v52, %v839_v47  ;;  %v1303_v7 = vrot.slane %v1301_v1, 1  ;;  %v2476_v10 = vld [vmem:[%s2682_s24 + $0x18] sm:$0xfe]   ;;  %v2477_v13 = vld [vmem:[%s2682_s24 + $0x20] ss:$0 sps:$4 sm:$0x11]  }
  0x25   : > { %v1310_v8 = vrot.slane %v1308_v4, 1  ;;  %v1299_v12 = vor.u32 %v1298_v5, %v1294_v63  ;;  %v407_v14 = vshrl.u32 %v2478_v6, 16  ;;  %v1315_v16 = vrot.slane %v1313_v9, 1  ;;  %v2479_v20 = vld [vmem:[%s2682_s24 + $0x20] ss:$0 sps:$4 sm:$0x11]  }
  0x26   : > { %v849_v62 = vsel %vm381_vm1, %v844_v56, %v848_v57  ;;  %v1510_v17 = vrot.slane %v2476_v10, 1  ;;  %v1511_v19 = vrot.slane %v2477_v13, 1  ;;  %v409_v21 = vshll.u32 %v2478_v6, 16  ;;  %v2480_v26 = vld [vmem:[%s2682_s24 + $0x24] sm:$0xfe]   ;;  %v2492_v50 = vld [vmem:[%s2682_s24 + $0x30] sm:$0xff]  }
  0x27   : > { %936 = vrot.lane.b32.xlu1 %v861_v55, %s2619_s29  ;;  %v1311_v15 = vor.u32 %v1310_v8, %v1306_v3  ;;  %v1304_v18 = vsel %vm381_vm1, %v1299_v12, %v1303_v7  ;;  %v419_v22 = vshrl.u32 %v2482_v11, 16  ;;  %v414_v25 = vshll.u32 %v2479_v20, 16  ;;  %v2481_v27 = vld [vmem:[%s2682_s24 + $0x2c] ss:$0 sps:$4 sm:$0x11]   ;;  %v2490_v47 = vld [vmem:[%s2682_s24 + $0x24] sm:$0xff]  }
  0x28   : > { %934 = vrot.lane.b32.xlu0 %v849_v62, %s2619_s29  ;;  %v411_v24 = vrot.slane %v409_v21, 1  ;;  %v421_v28 = vshll.u32 %v2482_v11, 16  ;;  %v1512_v29 = vsel %vm599_vm0, %v1510_v17, %v1511_v19  ;;  %v1513_v32 = vrot.slane %v2480_v26, 1  ;;  %v2483_v34 = vld [vmem:[%s2682_s24 + $0x2c] ss:$0 sps:$4 sm:$0x11]  }
  0x29   : > { %v1316_v23 = vsel %vm381_vm1, %v1311_v15, %v1315_v16  ;;  %v416_v31 = vrot.slane %v414_v25, 1  ;;  %v1514_v33 = vrot.slane %v2481_v27, 1  ;;  %v2484_v37 = vld [vmem:[%s2682_s24 + $0x18] sm:$0xfe]   ;;  %v426_v39 = vshll.u32 %v2483_v34, 16  ;;  %v2500_v16 = vld [vmem:[%s2682_s24 + $0x30] sm:$0xff]  }
  0x2a   : > { %v412_v30 = vor.u32 %v411_v24, %v407_v14  ;;  %v423_v35 = vrot.slane %v421_v28, 1  ;;  %v2485_v40 = vld [vmem:[%s2682_s24 + $0x20] ss:$0 sps:$4 sm:$0x11]   ;;  %v606_v42 = vrot.slane %v2484_v37, 1  ;;  %v863_v53 = vshrl.u32 %v2490_v47, 16 }
  0x2b   : > { %1174 = vrot.lane.b32.xlu1 %v2471_v54, %s2620_s30  ;;  %v1515_v41 = vsel %vm599_vm0, %v1513_v32, %v1514_v33  ;;  %v428_v43 = vrot.slane %v426_v39, 1  ;;  %v607_v44 = vrot.slane %v2485_v40, 1  ;;  %v2486_v45 = vld [vmem:[%s2682_s24 + $0x24] sm:$0xfe]   ;;  %v865_v56 = vshll.u32 %v2490_v47, 16  ;;  %v2502_v21 = vld [vmem:[%s2682_s24 + $0x3c] sm:$0xff]  }
  0x2c   : > { %1172 = vrot.lane.b32.xlu0 %v2470_v59, %s2620_s30  ;;  %v417_v36 = vsel %vm381_vm1, %v412_v30, %v416_v31  ;;  %v424_v38 = vor.u32 %v423_v35, %v419_v22  ;;  %v2487_v46 = vld [vmem:[%s2682_s24 + $0x2c] ss:$0 sps:$4 sm:$0x11]   ;;  %v609_v49 = vrot.slane %v2486_v45, 1  ;;  %v2488_v54 = vld [vmem:[%s2682_s24 + $0x24] sm:$0xff]   ;;  %v875_v62 = vshrl.u32 %v2492_v50, 16 }
  0x2d   : > { %v608_v51 = vsel %vm599_vm0, %v606_v42, %v607_v44  ;;  %v610_v52 = vrot.slane %v2487_v46, 1  ;;  %v2491_v55 = vld [vmem:[%s2682_s24 + $0x2c] ss:$0 sps:$4 sm:$0x11]   ;;  %v867_v59 = vrot.slane %v865_v56, 1  ;;  %v877_v63 = vshll.u32 %v2492_v50, 16 }
  0x2e   : > { %v429_v48 = vsel %vm381_vm1, %v424_v38, %v428_v43  ;;  %v870_v60 = vshll.u32 %v2491_v55, 16  ;;  %v2493_v61 = vld [vmem:[%s2682_s24 + $0x38] ss:$0 sps:$4 sm:$0x11]   ;;  %v2494_v3 = vld [vmem:[%s2682_s24 + $0x24] sm:$0xfe]  }
  0x2f   : > { %1391 = vrot.lane.b32.xlu1 %v1316_v23, %s2621_s4  ;;  %v611_v57 = vsel %vm599_vm0, %v609_v49, %v610_v52  ;;  %v868_v0 = vor.u32 %v867_v59, %v863_v53  ;;  %v882_v2 = vshll.u32 %v2493_v61, 16  ;;  %v879_v4 = vrot.slane %v877_v63, 1  ;;  %v2495_v5 = vld [vmem:[%s2682_s24 + $0x2c] ss:$0 sps:$4 sm:$0x11]   ;;  %v2498_v23 = vld [vmem:[%s2682_s24 + $0x30] sm:$0xff]  }
  0x30   : > { %1389 = vrot.lane.b32.xlu0 %v1304_v18, %s2621_s4  ;;  %v872_v1 = vrot.slane %v870_v60, 1  ;;  %v1061_v7 = vrot.slane %v2494_v3, 1  ;;  %v1062_v10 = vrot.slane %v2495_v5, 1  ;;  %v2496_v11 = vld [vmem:[%s2682_s24 + $0x30] sm:$0xfe]   ;;  %v1318_v19 = vshrl.u32 %v2500_v16, 16 }
  0x31   : > { %v884_v6 = vrot.slane %v882_v2, 1  ;;  %v880_v9 = vor.u32 %v879_v4, %v875_v62  ;;  %v2497_v12 = vld [vmem:[%s2682_s24 + $0x38] ss:$0 sps:$4 sm:$0x11]   ;;  %v1064_v14 = vrot.slane %v2496_v11, 1  ;;  %v1320_v20 = vshll.u32 %v2500_v16, 16 }
  0x32   : > { %v873_v8 = vsel %vm381_vm1, %v868_v0, %v872_v1  ;;  %v1065_v15 = vrot.slane %v2497_v12, 1  ;;  %v1063_v17 = vsel %vm599_vm0, %v1061_v7, %v1062_v10  ;;  %v2501_v18 = vld [vmem:[%s2682_s24 + $0x38] ss:$0 sps:$4 sm:$0x11]   ;;  %v2499_v24 = vld [vmem:[%s2682_s24 + $0x3c] sm:$0xff]   ;;  %v1330_v28 = vshrl.u32 %v2502_v21, 16 }
  0x33   : > { %482 = vrot.lane.b32.xlu1 %v417_v36, %s2618_s28  ;;  %v885_v13 = vsel %vm381_vm1, %v880_v9, %v884_v6  ;;  %v1322_v25 = vrot.slane %v1320_v20, 1  ;;  %v1325_v26 = vshll.u32 %v2501_v18, 16  ;;  %v2503_v27 = vld [vmem:[%s2682_s24 + $0x44] ss:$0 sps:$4 sm:$0x11]   ;;  %v2506_v30 = vld [vmem:[%s2682_s24 + $0x30] sm:$0xff]  }
  0x34   : > { %1534 = vrot.lane.b32.xlu0 %v1512_v29, %s2622_s5  ;;  %v1066_v22 = vsel %vm599_vm0, %v1064_v14, %v1065_v15  ;;  %v1332_v29 = vshll.u32 %v2502_v21, 16  ;;  %v1337_v33 = vshll.u32 %v2503_v27, 16  ;;  %v2504_v34 = vld [vmem:[%s2682_s24 + $0x30] sm:$0xfe]   ;;  %v431_v42 = vshrl.u32 %v2506_v30, 16  ;;  %v2510_v50 = vld [vmem:[%s2682_s24 + $0x3c] sm:$0xff]  }
  0x35   : > { %v1323_v31 = vor.u32 %v1322_v25, %v1318_v19  ;;  %v1327_v32 = vrot.slane %v1325_v26, 1  ;;  %v2505_v36 = vld [vmem:[%s2682_s24 + $0x38] ss:$0 sps:$4 sm:$0x11]   ;;  %v1516_v38 = vrot.slane %v2504_v34, 1  ;;  %v433_v43 = vshll.u32 %v2506_v30, 16 }
  0x36   : > { %v1334_v35 = vrot.slane %v1332_v29, 1  ;;  %v1339_v37 = vrot.slane %v1337_v33, 1  ;;  %v1517_v40 = vrot.slane %v2505_v36, 1  ;;  %v2509_v49 = vld [vmem:[%s2682_s24 + $0x44] ss:$0 sps:$4 sm:$0x11]  }
  0x37   : > { %484 = vrot.lane.b32.xlu1 %v429_v48, %s2618_s28  ;;  %v1328_v44 = vsel %vm381_vm1, %v1323_v31, %v1327_v32  ;;  %v435_v46 = vrot.slane %v433_v43, 1  ;;  %v2508_v48 = vld [vmem:[%s2682_s24 + $0x3c] sm:$0xfe]   ;;  %v1520_v55 = vrot.slane %v2509_v49, 1  ;;  %v2512_v60 = vld [vmem:[%s2682_s24 + $0x30] sm:$0xfe]  }
  0x38   : > { %1536 = vrot.lane.b32.xlu0 %v1515_v41, %s2622_s5  ;;  %v1335_v39 = vor.u32 %v1334_v35, %v1330_v28  ;;  %v2507_v41 = vld [vmem:[%s2682_s24 + $0x38] ss:$0 sps:$4 sm:$0x11]   ;;  %v1519_v53 = vrot.slane %v2508_v48, 1  ;;  %v612_v0 = vrot.slane %v2512_v60, 1  ;;  %v2518_v7 = vld [vmem:[%s2682_s24 + $0x3c] sm:$0xff]  }
  0x39   : > { %v438_v47 = vshll.u32 %v2507_v41, 16  ;;  %v2511_v56 = vld [vmem:[%s2682_s24 + $0x44] ss:$0 sps:$4 sm:$0x11]   ;;  %v2514_v5 = vld [vmem:[%s2682_s24 + $0x3c] sm:$0xfe]  }
  0x3a   : > { %v1340_v45 = vsel %vm381_vm1, %v1335_v39, %v1339_v37  ;;  %v450_v62 = vshll.u32 %v2511_v56, 16  ;;  %v2513_v63 = vld [vmem:[%s2682_s24 + $0x38] ss:$0 sps:$4 sm:$0x11]   ;;  %v1521_v1 = vsel %vm599_vm0, %v1519_v53, %v1520_v55  ;;  %v615_v9 = vrot.slane %v2514_v5, 1  ;;  %v2520_v10 = vld [vmem:[%s2682_s24 + $0x48] sm:$0xff]  }
  0x3b   : > { %630 = vrot.lane.b32.xlu1 %v611_v57, %s2617_s27  ;;  %v440_v52 = vrot.slane %v438_v47, 1  ;;  %v443_v57 = vshrl.u32 %v2510_v50, 16  ;;  %v613_v4 = vrot.slane %v2513_v63, 1  ;;  %v2515_v6 = vld [vmem:[%s2682_s24 + $0x44] ss:$0 sps:$4 sm:$0x11]  }
  0x3c   : > { %628 = vrot.lane.b32.xlu0 %v608_v51, %s2617_s27  ;;  %v436_v51 = vor.u32 %v435_v46, %v431_v42  ;;  %v452_v3 = vrot.slane %v450_v62, 1  ;;  %v616_v11 = vrot.slane %v2515_v6, 1  ;;  %v887_v12 = vshrl.u32 %v2518_v7, 16  ;;  %v2516_v19 = vld [vmem:[%s2682_s24 + $0x3c] sm:$0xff]   ;;  %v2517_v21 = vld [vmem:[%s2682_s24 + $0x48] sm:$0xff]   ;;  %v2530_v48 = vld [vmem:[%s2682_s24 + $0x54] sm:$0xff]  }
  0x3d   : > { %v889_v14 = vshll.u32 %v2518_v7, 16  ;;  %v899_v15 = vshrl.u32 %v2520_v10, 16  ;;  %v901_v18 = vshll.u32 %v2520_v10, 16  ;;  %v2522_v29 = vld [vmem:[%s2682_s24 + $0x3c] sm:$0xfe]   ;;  %v2528_v31 = vld [vmem:[%s2682_s24 + $0x48] sm:$0xff]  }
  0x3e   : > { %v441_v59 = vsel %vm381_vm1, %v436_v51, %v440_v52  ;;  %v617_v16 = vsel %vm599_vm0, %v615_v9, %v616_v11  ;;  %v2523_v30 = vld [vmem:[%s2682_s24 + $0x44] ss:$0 sps:$4 sm:$0x11]   ;;  %v1067_v33 = vrot.slane %v2522_v29, 1  ;;  %v2524_v34 = vld [vmem:[%s2682_s24 + $0x48] sm:$0xfe]  }
  0x3f   : > { %723 = vrot.lane.b32.xlu1 %v2489_v58, %s2615_s25  ;;  %v445_v58 = vshll.u32 %v2510_v50, 16  ;;  %v891_v20 = vrot.slane %v889_v14, 1  ;;  %v1068_v36 = vrot.slane %v2523_v30, 1  ;;  %v2525_v37 = vld [vmem:[%s2682_s24 + $0x50] ss:$0 sps:$4 sm:$0x11]  }
  0x40   : > { %721 = vrot.lane.b32.xlu0 %v2488_v54, %s2615_s25  ;;  %v1518_v54 = vsel %vm599_vm0, %v1516_v38, %v1517_v40  ;;  %v1070_v39 = vrot.slane %v2524_v34, 1  ;;  %v1342_v40 = vshrl.u32 %v2528_v31, 16  ;;  %v1071_v41 = vrot.slane %v2525_v37, 1  ;;  %v2526_v47 = vld [vmem:[%s2682_s24 + $0x48] sm:$0xff]   ;;  %v2527_v50 = vld [vmem:[%s2682_s24 + $0x54] sm:$0xff]   ;;  %s2011_s22 = sshll.u32 %s203_s21, 2 }
  0x41   : > { %v447_v61 = vrot.slane %v445_v58, 1  ;;  %v892_v25 = vor.u32 %v891_v20, %v887_v12  ;;  %v1344_v42 = vshll.u32 %v2528_v31, 16  ;;  %v1069_v43 = vsel %vm599_vm0, %v1067_v33, %v1068_v36  ;;  %v2531_v49 = vld [vmem:[%s2682_s24 + $0x5c] ss:$0 sps:$4 sm:$0x11]   ;;  %v2534_v55 = vld [vmem:[%s2682_s24 + $0x48] sm:$0xff]  }
  0x42   : > { %v1072_v46 = vsel %vm599_vm0, %v1070_v39, %v1071_v41  ;;  %v1354_v52 = vshrl.u32 %v2530_v48, 16  ;;  %v1356_v53 = vshll.u32 %v2530_v48, 16  ;;  %v2532_v58 = vld [vmem:[%s2682_s24 + $0x48] sm:$0xfe]   ;;  %v2536_v6 = vld [vmem:[%s2682_s24 + $0x54] sm:$0xfe]  }
  0x43   : > { %940 = vrot.lane.b32.xlu1 %v885_v13, %s2619_s29  ;;  %v448_v2 = vor.u32 %v447_v61, %v443_v57  ;;  %v614_v13 = vsel %vm599_vm0, %v612_v0, %v613_v4  ;;  %v1522_v62 = vrot.slane %v2532_v58, 1  ;;  %v455_v0 = vshrl.u32 %v2534_v55, 16  ;;  %v2537_v10 = vld [vmem:[%s2682_s24 + $0x5c] ss:$0 sps:$4 sm:$0x11]   ;;  %v2546_v31 = vld [vmem:[%s2682_s24 + $0x54] sm:$0xff]  }
  0x44   : > { %938 = vrot.lane.b32.xlu0 %v873_v8, %s2619_s29  ;;  %v1358_v60 = vrot.slane %v1356_v53, 1  ;;  %v457_v4 = vshll.u32 %v2534_v55, 16  ;;  %v1525_v12 = vrot.slane %v2536_v6, 1  ;;  %v2543_v30 = vld [vmem:[%s2682_s24 + $0x5c] ss:$0 sps:$4 sm:$0x11]  }
  0x45   : > { %v453_v8 = vsel %vm381_vm1, %v448_v2, %v452_v3  ;;  %v2535_v3 = vld [vmem:[%s2682_s24 + $0x50] ss:$0 sps:$4 sm:$0x11]   ;;  %v2548_v33 = vld [vmem:[%s2682_s24 + $0x60] sm:$0xff]   ;;  %v911_v36 = vshrl.u32 %v2546_v31, 16  ;;  %v913_v39 = vshll.u32 %v2546_v31, 16 }
  0x46   : > { %v1359_v2 = vor.u32 %v1358_v60, %v1354_v52  ;;  %v462_v9 = vshll.u32 %v2535_v3, 16  ;;  %v923_v41 = vshrl.u32 %v2548_v33, 16  ;;  %v2550_v52 = vld [vmem:[%s2682_s24 + $0x54] sm:$0xfe]   ;;  %v2556_v55 = vld [vmem:[%s2682_s24 + $0x60] sm:$0xff]   ;;  %v2558_v3 = vld [vmem:[%s2682_s24 + $0x6c] sm:$0xff]  }
  0x47   : > { %1085 = vrot.lane.b32.xlu1 %v1066_v22, %s2616_s26  ;;  %v2553_v60 = vld [vmem:[%s2682_s24 + $0x68] ss:$0 sps:$4 sm:$0x11]  }
  0x48   : > { %1083 = vrot.lane.b32.xlu0 %v1063_v17, %s2616_s26  ;;  %v2519_v17 = vld [vmem:[%s2682_s24 + $0x44] ss:$0 sps:$4 sm:$0x11]  }
  0x49   : > { %v894_v22 = vshll.u32 %v2519_v17, 16 }
  0x4b   : > { %1178 = vrot.lane.b32.xlu1 %v2499_v24, %s2620_s30  ;;  %v903_v24 = vrot.slane %v901_v18, 1  ;;  %v896_v26 = vrot.slane %v894_v22, 1  ;;  %v2539_v18 = vld [vmem:[%s2682_s24 + $0x5c] ss:$0 sps:$4 sm:$0x11]  }
  0x4c   : > { %1176 = vrot.lane.b32.xlu0 %v2498_v23, %s2620_s30  ;;  %v2521_v23 = vld [vmem:[%s2682_s24 + $0x50] ss:$0 sps:$4 sm:$0x11]  }
  0x4d   : > { %v904_v27 = vor.u32 %v903_v24, %v899_v15  ;;  %v906_v28 = vshll.u32 %v2521_v23, 16  ;;  %v897_v35 = vsel %vm381_vm1, %v892_v25, %v896_v26  ;;  %v464_v15 = vrot.slane %v462_v9, 1  ;;  %v2541_v24 = vld [vmem:[%s2682_s24 + $0x50] ss:$0 sps:$4 sm:$0x11]  }
  0x4e   : > { %v474_v23 = vshll.u32 %v2539_v18, 16  ;;  %v2542_v26 = vld [vmem:[%s2682_s24 + $0x54] sm:$0xfe]   ;;  %v619_v29 = vrot.slane %v2541_v24, 1 }
  0x4f   : > { %1395 = vrot.lane.b32.xlu1 %v1340_v45, %s2621_s4  ;;  %v908_v32 = vrot.slane %v906_v28, 1  ;;  %v1346_v45 = vrot.slane %v1344_v42, 1  ;;  %v925_v42 = vshll.u32 %v2548_v33, 16 }
  0x50   : > { %1393 = vrot.lane.b32.xlu0 %v1328_v44, %s2621_s4  ;;  %v2529_v44 = vld [vmem:[%s2682_s24 + $0x50] ss:$0 sps:$4 sm:$0x11]   ;;  %v476_v28 = vrot.slane %v474_v23, 1 }
  0x51   : > { %v909_v38 = vsel %vm381_vm1, %v904_v27, %v908_v32  ;;  %v1349_v51 = vshll.u32 %v2529_v44, 16  ;;  %v1347_v56 = vor.u32 %v1346_v45, %v1342_v40  ;;  %v621_v32 = vrot.slane %v2542_v26, 1 }
  0x52   : > { %v915_v44 = vrot.slane %v913_v39, 1  ;;  %v927_v48 = vrot.slane %v925_v42, 1  ;;  %v2568_v39 = vld [vmem:[%s3054_s1 + $0x8] sm:$0xff]  }
  0x53   : > { %486 = vrot.lane.b32.xlu1 %v441_v59, %s2618_s28  ;;  %v1351_v57 = vrot.slane %v1349_v51, 1  ;;  %v2533_v59 = vld [vmem:[%s2682_s24 + $0x50] ss:$0 sps:$4 sm:$0x11]  }
  0x54   : > { %1538 = vrot.lane.b32.xlu0 %v1518_v54, %s2622_s5  ;;  %v1361_v54 = vshll.u32 %v2531_v49, 16  ;;  %v1523_v63 = vrot.slane %v2533_v59, 1  ;;  %v916_v49 = vor.u32 %v915_v44, %v911_v36  ;;  %v928_v53 = vor.u32 %v927_v48, %v923_v41  ;;  %v2552_v59 = vld [vmem:[%s2682_s24 + $0x60] sm:$0xfe]   ;;  %v2573_v48 = vld [vmem:[%s2682_s24 + $0x48] sm:$0xff]  }
  0x55   : > { %v1352_v5 = vsel %vm381_vm1, %v1347_v56, %v1351_v57  ;;  %v1073_v57 = vrot.slane %v2550_v52, 1  ;;  %v2566_v36 = vld [vmem:[%s3054_s1] sm:$0xff]   ;;  %291 = vst.msk [vmem:[#allocation2 + $0x30] sm:$0xff] %vm284_vm2, %v2573_v48 }
  0x56   : > { %v1363_v61 = vrot.slane %v1361_v54, 1  ;;  %v1524_v17 = vsel %vm599_vm0, %v1522_v62, %v1523_v63  ;;  %v2551_v54 = vld [vmem:[%s2682_s24 + $0x5c] ss:$0 sps:$4 sm:$0x11]   ;;  %v1076_v63 = vrot.slane %v2552_v59, 1  ;;  %2373 = vmatprep.subr.bf16.mxu0 %v2566_v36  ;;  %2395 = vmatprep.subr.bf16.mxu1 %v2566_v36 }
  0x57   : > { %488 = vrot.lane.b32.xlu1 %v453_v8, %s2618_s28  ;;  %v459_v8 = vrot.slane %v457_v4, 1  ;;  %v1074_v58 = vrot.slane %v2551_v54, 1  ;;  %2374 = vmatpush3.bf16.msra.mxu0 %v2566_v36 }
  0x58   : > { %1540 = vrot.lane.b32.xlu0 %v1521_v1, %s2622_s5  ;;  %v2538_v1 = vld [vmem:[%s2682_s24 + $0x54] sm:$0xff]   ;;  %v1364_v7 = vsel %vm381_vm1, %v1359_v2, %v1363_v61  ;;  %v2557_v2 = vld [vmem:[%s2682_s24 + $0x68] ss:$0 sps:$4 sm:$0x11]   ;;  %2375 = vmatprep.subr.bf16.mxu0 %v2568_v39 }
  0x59   : > { %v467_v11 = vshrl.u32 %v2538_v1, 16  ;;  %v460_v14 = vor.u32 %v459_v8, %v455_v0  ;;  %v1077_v0 = vrot.slane %v2553_v60, 1  ;;  %v1075_v4 = vsel %vm599_vm0, %v1073_v57, %v1074_v58  ;;  %2398 = vmatpush3.bf16.msra.mxu1 %v2566_v36 }
  0x5a   : > { %2396 = vmatprep.subr.bf16.mxu1 %v2568_v39 }
  0x5b   : > { %634 = vrot.lane.b32.xlu1 %v617_v16, %s2617_s27  ;;  %v1526_v16 = vrot.slane %v2537_v10, 1  ;;  %v465_v20 = vsel %vm381_vm1, %v460_v14, %v464_v15  ;;  %v1078_v9 = vsel %vm599_vm0, %v1076_v63, %v1077_v0  ;;  %v2554_v10 = vld [vmem:[%s2682_s24 + $0x60] sm:$0xff]   ;;  %v1380_v14 = vshll.u32 %v2558_v3, 16  ;;  %v2555_v15 = vld [vmem:[%s2682_s24 + $0x6c] sm:$0xff]   ;;  %2376 = vmatpush3.bf16.msra.mxu0 %v2568_v39 }
  0x5c   : > { %632 = vrot.lane.b32.xlu0 %v614_v13, %s2617_s27  ;;  %v469_v13 = vshll.u32 %v2538_v1, 16  ;;  %v1368_v1 = vshll.u32 %v2556_v55, 16 }
  0x5d   : > { %v1527_v27 = vsel %vm599_vm0, %v1525_v12, %v1526_v16  ;;  %v2559_v12 = vld [vmem:[%s2682_s24 + $0x74] ss:$0 sps:$4 sm:$0x11]   ;;  %v2560_v16 = vld [vmem:[%s2682_s24] sm:$0xff]   ;;  %v1382_v18 = vrot.slane %v1380_v14, 1  ;;  %2399 = vmatpush3.bf16.msra.mxu1 %v2568_v39 }
  0x5e   : > { %v1370_v8 = vrot.slane %v1368_v1, 1  ;;  %285 = vst.msk [vmem:[#allocation2] sm:$0xff] %vm284_vm2, %v2560_v16 }
  0x5f   : > { %727 = vrot.lane.b32.xlu1 %v2517_v21, %s2615_s25  ;;  %v2540_v21 = vld [vmem:[%s2682_s24 + $0x48] sm:$0xfe]  }
  0x60   : > { %725 = vrot.lane.b32.xlu0 %v2516_v19, %s2615_s25  ;;  %v471_v19 = vrot.slane %v469_v13, 1  ;;  %v618_v25 = vrot.slane %v2540_v21, 1  ;;  %v1378_v13 = vshrl.u32 %v2558_v3, 16 }
  0x62   : > { %v472_v22 = vor.u32 %v471_v19, %v467_v11  ;;  %v620_v37 = vsel %vm599_vm0, %v618_v25, %v619_v29  ;;  %v1373_v11 = vshll.u32 %v2557_v2, 16  ;;  %v1385_v19 = vshll.u32 %v2559_v12, 16  ;;  %v2562_v25 = vld [vmem:[%s2682_s24 + $0x68] ss:$0 sps:$4 sm:$0x11]  }
  0x63   : > { %944 = vrot.lane.b32.xlu1 %v909_v38, %s2619_s29  ;;  %v2547_v38 = vld [vmem:[%s2682_s24 + $0x5c] ss:$0 sps:$4 sm:$0x11]   ;;  %v1383_v23 = vor.u32 %v1382_v18, %v1378_v13  ;;  %v2564_v29 = vld [vmem:[%s2682_s24 + $0x74] ss:$0 sps:$4 sm:$0x11]  }
  0x64   : > { %942 = vrot.lane.b32.xlu0 %v897_v35, %s2619_s29  ;;  %v477_v34 = vsel %vm381_vm1, %v472_v22, %v476_v28  ;;  %v622_v35 = vrot.slane %v2543_v30, 1  ;;  %v918_v45 = vshll.u32 %v2547_v38, 16  ;;  %v2561_v22 = vld [vmem:[%s2682_s24 + $0x60] sm:$0xfe]   ;;  %v1387_v24 = vrot.slane %v1385_v19, 1  ;;  %v2567_v38 = vld [vmem:[%s2682_s24 + $0x18] sm:$0xff]  }
  0x65   : > { %v2563_v28 = vld [vmem:[%s2682_s24 + $0x6c] sm:$0xfe]   ;;  %v1528_v31 = vrot.slane %v2561_v22, 1  ;;  %287 = vst.msk [vmem:[#allocation2 + $0x10] sm:$0xff] %vm284_vm2, %v2567_v38 }
  0x66   : > { %v623_v40 = vsel %vm599_vm0, %v621_v32, %v622_v35  ;;  %v1529_v32 = vrot.slane %v2562_v25, 1  ;;  %v1388_v33 = vsel %vm381_vm1, %v1383_v23, %v1387_v24  ;;  %v1532_v35 = vrot.slane %v2564_v29, 1 }
  0x67   : > { %1089 = vrot.lane.b32.xlu1 %v1072_v46, %s2616_s26  ;;  %v2549_v46 = vld [vmem:[%s2682_s24 + $0x68] ss:$0 sps:$4 sm:$0x11]  }
  0x68   : > { %1087 = vrot.lane.b32.xlu0 %v1069_v43, %s2616_s26  ;;  %v2544_v43 = vld [vmem:[%s2682_s24 + $0x54] sm:$0xff]   ;;  %v930_v51 = vshll.u32 %v2549_v46, 16  ;;  %v1530_v42 = vsel %vm599_vm0, %v1528_v31, %v1529_v32 }
  0x6a   : > { %v932_v56 = vrot.slane %v930_v51, 1 }
  0x6b   : > { %1182 = vrot.lane.b32.xlu1 %v2527_v50, %s2620_s30  ;;  %v920_v50 = vrot.slane %v918_v45, 1  ;;  %v2571_v45 = vld [vmem:[%s2682_s24 + $0x30] sm:$0xff]  }
  0x6c   : > { %1180 = vrot.lane.b32.xlu0 %v2526_v47, %s2620_s30  ;;  %v2545_v47 = vld [vmem:[%s2682_s24 + $0x60] sm:$0xff]   ;;  %v933_v62 = vsel %vm381_vm1, %v928_v53, %v932_v56  ;;  %289 = vst.msk [vmem:[#allocation2 + $0x20] sm:$0xff] %vm284_vm2, %v2571_v45 }
  0x6d   : > { %v921_v61 = vsel %vm381_vm1, %v916_v49, %v920_v50  ;;  %v2574_v49 = vld [vmem:[%s2682_s24 + $0x54] sm:$0xff]  }
  0x6e   : > { %292 = vst.msk [vmem:[#allocation2 + $0x38] sm:$0xff] %vm284_vm2, %v2574_v49 }
  0x6f   : > { %1399 = vrot.lane.b32.xlu1 %v1364_v7, %s2621_s4  ;;  %v1366_v7 = vshrl.u32 %v2556_v55, 16 }
  0x70   : > { %1397 = vrot.lane.b32.xlu0 %v1352_v5, %s2621_s4 }
  0x71   : > { %v1371_v21 = vor.u32 %v1370_v8, %v1366_v7 }
  0x73   : > { %490 = vrot.lane.b32.xlu1 %v465_v20, %s2618_s28  ;;  %v2565_v20 = vld [vmem:[%s2682_s24 + $0xc] sm:$0xff]  }
  0x74   : > { %1542 = vrot.lane.b32.xlu0 %v1524_v17, %s2622_s5  ;;  %v1375_v17 = vrot.slane %v1373_v11, 1  ;;  %286 = vst.msk [vmem:[#allocation2 + $0x8] sm:$0xff] %vm284_vm2, %v2565_v20 }
  0x76   : > { %v1376_v30 = vsel %vm381_vm1, %v1371_v21, %v1375_v17 }
  0x77   : > { %492 = vrot.lane.b32.xlu1 %v477_v34, %s2618_s28  ;;  %v1531_v34 = vrot.slane %v2563_v28, 1 }
  0x78   : > { %1544 = vrot.lane.b32.xlu0 %v1527_v27, %s2622_s5 }
  0x79   : > { %v1533_v44 = vsel %vm599_vm0, %v1531_v34, %v1532_v35 }
  0x7b   : > { %638 = vrot.lane.b32.xlu1 %v623_v40, %s2617_s27  ;;  %v2569_v40 = vld [vmem:[%s2682_s24 + $0x24] sm:$0xff]  }
  0x7c   : > { %636 = vrot.lane.b32.xlu0 %v620_v37, %s2617_s27  ;;  %288 = vst.msk [vmem:[#allocation2 + $0x18] sm:$0xff] %vm284_vm2, %v2569_v40 }
  0x7f   : > { %731 = vrot.lane.b32.xlu1 %v2545_v47, %s2615_s25  ;;  %v2572_v47 = vld [vmem:[%s2682_s24 + $0x3c] sm:$0xff]  }
  0x80   : > { %729 = vrot.lane.b32.xlu0 %v2544_v43, %s2615_s25  ;;  %v2570_v43 = vld [vmem:[%s3054_s1 + $0x10] ss:$0 sps:$4 sm:$0x33]   ;;  %290 = vst.msk [vmem:[#allocation2 + $0x28] sm:$0xff] %vm284_vm2, %v2572_v47  ;;  %s3022_s25 = scalar_lea.vmem %s3055_s2, %s2011_s22 }
  0x81   : > { %2401 = vmatprep.subr.msk.bf16.mxu0 %vm1620_vm6, %v2570_v43  ;;  %v1622_v51 = vsel %vm1620_vm6, %v2570_v43, 0  ;;  %2402 = vmatprep.subr.msk.bf16.mxu1 %vm1620_vm6, %v2570_v43 }
  0x82   : > { %2378 = vmatpush3.bf16.msra.mxu0 %v1622_v51  ;;  %2400 = vmatpush3.bf16.msra.mxu1 %v1622_v51 }
  0x83   : > { %948 = vrot.lane.b32.xlu1 %v933_v62, %s2619_s29 }
  0x84   : > { %946 = vrot.lane.b32.xlu0 %v921_v61, %s2619_s29 }
  0x87   : > { %1093 = vrot.lane.b32.xlu1 %v1078_v9, %s2616_s26 }
  0x88   : > { %v2888_v5 = vpop.permute.xlu1 %719  ;;  %v2890_v6 = vpop.permute.xlu0 %717  ;;  %1091 = vrot.lane.b32.xlu0 %v1075_v4, %s2616_s26  ;;  %s2012_s26 = sshll.u32 %s3068_s13, 1 }
  0x89   : > { %s212_s27 = sadd.s32 %s2012_s26, %s3072_s12 }
  0x8a   : > { %s2013_s28 = sshll.u32 %s212_s27, 1 }
  0x8b   : > { %1186 = vrot.lane.b32.xlu1 %v2555_v15, %s2620_s30 }
  0x8c   : > { %v2904_v26 = vpop.permute.xlu0 %1079  ;;  %1184 = vrot.lane.b32.xlu0 %v2554_v10, %s2620_s30 }
  0x8d   : > { %v625_v27 = vpop.permute.xlu1 %624 }
  0x8f   : > { %1403 = vrot.lane.b32.xlu1 %v1388_v33, %s2621_s4 }
  0x90   : > { %1401 = vrot.lane.b32.xlu0 %v1376_v30, %s2621_s4  ;;  %s214_s4 = scalar_lea.vmem %s3056_s3, %s2013_s28 }
  0x91   : > { %v627_v37 = vpop.permute.xlu1 %626 }
  0x92   : > { %v479_v41 = vpop.permute.xlu0 %478 }
  0x93   : > { %503 = vst.msk [vmem:[#allocation2] sm:$0xff] %vm502_vm3, %v479_v41  ;;  %1548 = vrot.lane.b32.xlu1 %v1533_v44, %s2622_s5 }
  0x94   : > { %649 = vst.msk [vmem:[#allocation2] sm:$0xff] %vm648_vm4, %v625_v27  ;;  %1546 = vrot.lane.b32.xlu0 %v1530_v42, %s2622_s5 }
  0x95   : > { %v1082_v46 = vpop.permute.xlu1 %1081  ;;  %742 = vst.msk [vmem:[#allocation2] sm:$0xff] %vm741_vm5, %v2890_v6 }
  0x96   : > { %v481_v50 = vpop.permute.xlu0 %480 }
  0x97   : > { %504 = vst.msk [vmem:[#allocation2 + $0x8] sm:$0xff] %vm502_vm3, %v481_v50 }
  0x98   : > { %650 = vst.msk [vmem:[#allocation2 + $0x8] sm:$0xff] %vm648_vm4, %v627_v37 }
  0x99   : > { %v937_v52 = vpop.permute.xlu1 %936  ;;  %743 = vst.msk [vmem:[#allocation2 + $0x8] sm:$0xff] %vm741_vm5, %v2888_v5 }
  0x9a   : > { %960 = vst.msk [vmem:[#allocation2 + $0x8] sm:$0xff] %vm958_vm7, %v937_v52  ;;  %v935_v53 = vpop.permute.xlu0 %934 }
  0x9b   : > { %959 = vst.msk [vmem:[#allocation2] sm:$0xff] %vm958_vm7, %v935_v53 }
  0x9c   : > { %1105 = vst.msk [vmem:[#allocation2 + $0x8] sm:$0xff] %vm1103_vm8, %v1082_v46  ;;  %1104 = vst.msk [vmem:[#allocation2] sm:$0xff] %vm1103_vm8, %v2904_v26 }
  0x9d   : > { %v1175_v54 = vpop.permute.xlu1 %1174 }
  0x9e   : > { %1198 = vst.msk [vmem:[#allocation2 + $0x8] sm:$0xff] %vm1196_vm9, %v1175_v54  ;;  %v1173_v55 = vpop.permute.xlu0 %1172 }
  0x9f   : > { %1197 = vst.msk [vmem:[#allocation2] sm:$0xff] %vm1196_vm9, %v1173_v55 }
  0xa1   : > { %v1392_v56 = vpop.permute.xlu1 %1391 }
  0xa2   : > { %v1390_v57 = vpop.permute.xlu0 %1389  ;;  %1415 = vst.msk [vmem:[#allocation2 + $0x8] sm:$0xff] %vm1413_vm10, %v1392_v56 }
  0xa3   : > { %1414 = vst.msk [vmem:[#allocation2] sm:$0xff] %vm1413_vm10, %v1390_v57 }
  0xa5   : > { %v483_v59 = vpop.permute.xlu1 %482 }
  0xa6   : > { %v1535_v58 = vpop.permute.xlu0 %1534  ;;  %505 = vst.msk [vmem:[#allocation2 + $0x10] sm:$0xff] %vm502_vm3, %v483_v59 }
  0xa7   : > { %1559 = vst.msk [vmem:[#allocation2] sm:$0xff] %vm1558_vm11, %v1535_v58 }
  0xa9   : > { %v485_v61 = vpop.permute.xlu1 %484 }
  0xaa   : > { %v1537_v60 = vpop.permute.xlu0 %1536  ;;  %506 = vst.msk [vmem:[#allocation2 + $0x18] sm:$0xff] %vm502_vm3, %v485_v61 }
  0xab   : > { %1560 = vst.msk [vmem:[#allocation2 + $0x8] sm:$0xff] %vm1558_vm11, %v1537_v60 }
  0xad   : > { %v631_v0 = vpop.permute.xlu1 %630 }
  0xae   : > { %v629_v62 = vpop.permute.xlu0 %628  ;;  %v1567_v63 = vld [vmem:[#allocation2] sm:$0xff]  ;;  %652 = vst.msk [vmem:[#allocation2 + $0x18] sm:$0xff] %vm648_vm4, %v631_v0 }
  0xaf   : > { %651 = vst.msk [vmem:[#allocation2 + $0x10] sm:$0xff] %vm648_vm4, %v629_v62  ;;  %2379 = vmatprep.mubr.msk.bf16.mxu0 %vm1595_vm12, %v1567_v63 }
  0xb1   : > { %v724_v3 = vpop.permute.xlu1 %723 }
  0xb2   : > { %v722_v1 = vpop.permute.xlu0 %721  ;;  %v1568_v2 = vld [vmem:[#allocation2 + $0x8] sm:$0xff]  ;;  %745 = vst.msk [vmem:[#allocation2 + $0x18] sm:$0xff] %vm741_vm5, %v724_v3 }
  0xb3   : > { %744 = vst.msk [vmem:[#allocation2 + $0x10] sm:$0xff] %vm741_vm5, %v722_v1  ;;  %2380 = vmatmul.mubr.msk.bf16.vlgmr.msra.gmra.mrb[0].mxu0 %vm1595_vm12, %v1568_v2 }
  0xb5   : > { %v941_v5 = vpop.permute.xlu1 %940 }
  0xb6   : > { %v939_v4 = vpop.permute.xlu0 %938  ;;  %962 = vst.msk [vmem:[#allocation2 + $0x18] sm:$0xff] %vm958_vm7, %v941_v5 }
  0xb7   : > { %961 = vst.msk [vmem:[#allocation2 + $0x10] sm:$0xff] %vm958_vm7, %v939_v4 }
  0xb9   : > { %v1086_v7 = vpop.permute.xlu1 %1085 }
  0xba   : > { %v1084_v6 = vpop.permute.xlu0 %1083  ;;  %1107 = vst.msk [vmem:[#allocation2 + $0x18] sm:$0xff] %vm1103_vm8, %v1086_v7 }
  0xbb   : > { %1106 = vst.msk [vmem:[#allocation2 + $0x10] sm:$0xff] %vm1103_vm8, %v1084_v6 }
  0xbd   : > { %v1179_v9 = vpop.permute.xlu1 %1178 }
  0xbe   : > { %v1177_v8 = vpop.permute.xlu0 %1176  ;;  %1200 = vst.msk [vmem:[#allocation2 + $0x18] sm:$0xff] %vm1196_vm9, %v1179_v9 }
  0xbf   : > { %1199 = vst.msk [vmem:[#allocation2 + $0x10] sm:$0xff] %vm1196_vm9, %v1177_v8 }
  0xc1   : > { %v1396_v11 = vpop.permute.xlu1 %1395 }
  0xc2   : > { %v1394_v10 = vpop.permute.xlu0 %1393  ;;  %1417 = vst.msk [vmem:[#allocation2 + $0x18] sm:$0xff] %vm1413_vm10, %v1396_v11 }
  0xc3   : > { %1416 = vst.msk [vmem:[#allocation2 + $0x10] sm:$0xff] %vm1413_vm10, %v1394_v10 }
  0xc5   : > { %v487_v13 = vpop.permute.xlu1 %486 }
  0xc6   : > { %v1539_v12 = vpop.permute.xlu0 %1538  ;;  %507 = vst.msk [vmem:[#allocation2 + $0x20] sm:$0xff] %vm502_vm3, %v487_v13 }
  0xc7   : > { %1561 = vst.msk [vmem:[#allocation2 + $0x10] sm:$0xff] %vm1558_vm11, %v1539_v12 }
  0xc9   : > { %v489_v15 = vpop.permute.xlu1 %488 }
  0xca   : > { %v1541_v14 = vpop.permute.xlu0 %1540  ;;  %508 = vst.msk [vmem:[#allocation2 + $0x28] sm:$0xff] %vm502_vm3, %v489_v15 }
  0xcb   : > { %1562 = vst.msk [vmem:[#allocation2 + $0x18] sm:$0xff] %vm1558_vm11, %v1541_v14 }
  0xcd   : > { %v635_v18 = vpop.permute.xlu1 %634 }
  0xce   : > { %v633_v16 = vpop.permute.xlu0 %632  ;;  %v1569_v17 = vld [vmem:[#allocation2 + $0x10] sm:$0xff]  ;;  %654 = vst.msk [vmem:[#allocation2 + $0x28] sm:$0xff] %vm648_vm4, %v635_v18 }
  0xcf   : > { %653 = vst.msk [vmem:[#allocation2 + $0x20] sm:$0xff] %vm648_vm4, %v633_v16  ;;  %2383 = vmatprep.mubr.msk.bf16.mxu0 %vm1595_vm12, %v1569_v17 }
  0xd1   : > { %v728_v21 = vpop.permute.xlu1 %727 }
  0xd2   : > { %v726_v19 = vpop.permute.xlu0 %725  ;;  %v1570_v20 = vld [vmem:[#allocation2 + $0x18] sm:$0xff]  ;;  %747 = vst.msk [vmem:[#allocation2 + $0x28] sm:$0xff] %vm741_vm5, %v728_v21 }
  0xd3   : > { %746 = vst.msk [vmem:[#allocation2 + $0x20] sm:$0xff] %vm741_vm5, %v726_v19  ;;  %2384 = vmatmul.mubr.msk.bf16.gmra.mrb[4].mxu0 %vm1595_vm12, %v1570_v20 }
  0xd5   : > { %v945_v23 = vpop.permute.xlu1 %944 }
  0xd6   : > { %v943_v22 = vpop.permute.xlu0 %942  ;;  %964 = vst.msk [vmem:[#allocation2 + $0x28] sm:$0xff] %vm958_vm7, %v945_v23 }
  0xd7   : > { %963 = vst.msk [vmem:[#allocation2 + $0x20] sm:$0xff] %vm958_vm7, %v943_v22 }
  0xd9   : > { %v1090_v25 = vpop.permute.xlu1 %1089 }
  0xda   : > { %v1088_v24 = vpop.permute.xlu0 %1087  ;;  %1109 = vst.msk [vmem:[#allocation2 + $0x28] sm:$0xff] %vm1103_vm8, %v1090_v25 }
  0xdb   : > { %1108 = vst.msk [vmem:[#allocation2 + $0x20] sm:$0xff] %vm1103_vm8, %v1088_v24 }
  0xdd   : > { %v1183_v27 = vpop.permute.xlu1 %1182 }
  0xde   : > { %v1181_v26 = vpop.permute.xlu0 %1180  ;;  %1202 = vst.msk [vmem:[#allocation2 + $0x28] sm:$0xff] %vm1196_vm9, %v1183_v27 }
  0xdf   : > { %1201 = vst.msk [vmem:[#allocation2 + $0x20] sm:$0xff] %vm1196_vm9, %v1181_v26 }
  0xe1   : > { %v1400_v29 = vpop.permute.xlu1 %1399 }
  0xe2   : > { %v1398_v28 = vpop.permute.xlu0 %1397  ;;  %1419 = vst.msk [vmem:[#allocation2 + $0x28] sm:$0xff] %vm1413_vm10, %v1400_v29 }
  0xe3   : > { %1418 = vst.msk [vmem:[#allocation2 + $0x20] sm:$0xff] %vm1413_vm10, %v1398_v28 }
  0xe5   : > { %v491_v31 = vpop.permute.xlu1 %490 }
  0xe6   : > { %v1543_v30 = vpop.permute.xlu0 %1542  ;;  %509 = vst.msk [vmem:[#allocation2 + $0x30] sm:$0xff] %vm502_vm3, %v491_v31 }
  0xe7   : > { %1563 = vst.msk [vmem:[#allocation2 + $0x20] sm:$0xff] %vm1558_vm11, %v1543_v30 }
  0xe9   : > { %v493_v33 = vpop.permute.xlu1 %492 }
  0xea   : > { %v1545_v32 = vpop.permute.xlu0 %1544  ;;  %510 = vst.msk [vmem:[#allocation2 + $0x38] sm:$0xff] %vm502_vm3, %v493_v33 }
  0xeb   : > { %1564 = vst.msk [vmem:[#allocation2 + $0x28] sm:$0xff] %vm1558_vm11, %v1545_v32 }
  0xed   : > { %v639_v36 = vpop.permute.xlu1 %638 }
  0xee   : > { %v637_v34 = vpop.permute.xlu0 %636  ;;  %v1571_v35 = vld [vmem:[#allocation2 + $0x20] sm:$0xff]  ;;  %656 = vst.msk [vmem:[#allocation2 + $0x38] sm:$0xff] %vm648_vm4, %v639_v36 }
  0xef   : > { %655 = vst.msk [vmem:[#allocation2 + $0x30] sm:$0xff] %vm648_vm4, %v637_v34  ;;  %2387 = vmatprep.mubr.msk.bf16.mxu1 %vm1595_vm12, %v1571_v35 }
  0xf1   : > { %v732_v39 = vpop.permute.xlu1 %731 }
  0xf2   : > { %v730_v37 = vpop.permute.xlu0 %729  ;;  %v1572_v38 = vld [vmem:[#allocation2 + $0x28] sm:$0xff]  ;;  %749 = vst.msk [vmem:[#allocation2 + $0x38] sm:$0xff] %vm741_vm5, %v732_v39 }
  0xf3   : > { %748 = vst.msk [vmem:[#allocation2 + $0x30] sm:$0xff] %vm741_vm5, %v730_v37  ;;  %2388 = vmatmul.mubr.msk.bf16.vlgmr.msra.gmra.mrb[0].mxu1 %vm1595_vm12, %v1572_v38 }
  0xf5   : > { %v949_v41 = vpop.permute.xlu1 %948 }
  0xf6   : > { %v947_v40 = vpop.permute.xlu0 %946  ;;  %966 = vst.msk [vmem:[#allocation2 + $0x38] sm:$0xff] %vm958_vm7, %v949_v41 }
  0xf7   : > { %965 = vst.msk [vmem:[#allocation2 + $0x30] sm:$0xff] %vm958_vm7, %v947_v40 }
  0xf9   : > { %v1094_v43 = vpop.permute.xlu1 %1093 }
  0xfa   : > { %v1092_v42 = vpop.permute.xlu0 %1091  ;;  %1111 = vst.msk [vmem:[#allocation2 + $0x38] sm:$0xff] %vm1103_vm8, %v1094_v43 }
  0xfb   : > { %1110 = vst.msk [vmem:[#allocation2 + $0x30] sm:$0xff] %vm1103_vm8, %v1092_v42 }
  0xfd   : > { %v1187_v45 = vpop.permute.xlu1 %1186 }
  0xfe   : > { %v1185_v44 = vpop.permute.xlu0 %1184  ;;  %1204 = vst.msk [vmem:[#allocation2 + $0x38] sm:$0xff] %vm1196_vm9, %v1187_v45 }
  0xff   : > { %1203 = vst.msk [vmem:[#allocation2 + $0x30] sm:$0xff] %vm1196_vm9, %v1185_v44 }
 0x101   : > { %v1404_v47 = vpop.permute.xlu1 %1403 }
 0x102   : > { %v1402_v46 = vpop.permute.xlu0 %1401  ;;  %1421 = vst.msk [vmem:[#allocation2 + $0x38] sm:$0xff] %vm1413_vm10, %v1404_v47 }
 0x103   : > { %1420 = vst.msk [vmem:[#allocation2 + $0x30] sm:$0xff] %vm1413_vm10, %v1402_v46 }
 0x105   : > { %v1549_v49 = vpop.permute.xlu1 %1548 }
 0x106   : > { %v1547_v48 = vpop.permute.xlu0 %1546  ;;  %1566 = vst.msk [vmem:[#allocation2 + $0x38] sm:$0xff] %vm1558_vm11, %v1549_v49 }
 0x107   : > { %1565 = vst.msk [vmem:[#allocation2 + $0x30] sm:$0xff] %vm1558_vm11, %v1547_v48 }
 0x10d   : > { %v1574_v51 = vld [vmem:[#allocation2 + $0x38] sm:$0xff] }
 0x10e   : > { %v1573_v50 = vld [vmem:[#allocation2 + $0x30] sm:$0xff] }
 0x10f   : > { %2391 = vmatprep.mubr.msk.bf16.mxu1 %vm1595_vm12, %v1573_v50 }
 0x110   : > { %2392 = vmatmul.mubr.msk.bf16.gmra.mrb[4].mxu1 %vm1595_vm12, %v1574_v51 }
 0x186   : > { %v2381_v52 = vpop.f32.mrb[0].mxu0 }
 0x187   : > { %v1658_v53 = vpop.f32.mrb[1].mxu0  ;;  %v1824_v61 = vmul.f32 %v2381_v52, %v2381_v52 }
 0x188   : > { %v2382_v54 = vpop.f32.mrb[2].mxu0  ;;  %v1822_v57 = vmul.f32 %v1658_v53, %v1658_v53 }
 0x189   : > { %v2323_v55 = vpack.c.bf16 %v2382_v54, %v2381_v52  ;;  %v1661_v56 = vpop.f32.mrb[3].mxu0  ;;  %v1825_v0 = vmul.f32 %v2382_v54, %v2382_v54 }
 0x18a   : > { %v2318_v58 = vpack.c.bf16 %v1661_v56, %v1658_v53  ;;  %v1801_v59 = vadd.f32 %v1661_v56, %v1658_v53  ;;  %v1823_v60 = vmul.f32 %v1661_v56, %v1661_v56 }
 0x18b   : > { %2355 = vst [vmem:[%s3022_s25 + $0x8] sm:$0xff] %v2323_v55  }
 0x18c   : > { %2319 = vst [vmem:[%s3022_s25] sm:$0xff] %v2318_v58   ;;  %v1802_v62 = vadd.f32 %v2381_v52, %v1801_v59  ;;  %v1838_v63 = vadd.f32 %v1823_v60, %v1822_v57 }
 0x18e   : > { %v1839_v1 = vadd.f32 %v1838_v63, %v1824_v61  ;;  %v1803_v2 = vadd.f32 %v2382_v54, %v1802_v62 }
 0x190   : > { %v1840_v3 = vadd.f32 %v1839_v1, %v1825_v0 }
 0x1a6   : > { %v2385_v4 = vpop.f32.mrb[4].mxu0 }
 0x1a7   : > { %v1674_v5 = vpop.f32.mrb[5].mxu0  ;;  %v1828_v15 = vmul.f32 %v2385_v4, %v2385_v4 }
 0x1a8   : > { %v1804_v6 = vadd.f32 %v1803_v2, %v1674_v5  ;;  %v1826_v7 = vmul.f32 %v1674_v5, %v1674_v5  ;;  %v2386_v8 = vpop.f32.mrb[6].mxu0 }
 0x1a9   : > { %v2333_v9 = vpack.c.bf16 %v2386_v8, %v2385_v4  ;;  %v1677_v10 = vpop.f32.mrb[7].mxu0  ;;  %v1829_v18 = vmul.f32 %v2386_v8, %v2386_v8 }
 0x1aa   : > { %v1841_v11 = vadd.f32 %v1840_v3, %v1826_v7  ;;  %v2328_v12 = vpack.c.bf16 %v1677_v10, %v1674_v5  ;;  %v1805_v13 = vadd.f32 %v1804_v6, %v1677_v10  ;;  %v1827_v14 = vmul.f32 %v1677_v10, %v1677_v10 }
 0x1ab   : > { %2357 = vst [vmem:[%s3022_s25 + $0x18] sm:$0xff] %v2333_v9  }
 0x1ac   : > { %2356 = vst [vmem:[%s3022_s25 + $0x10] sm:$0xff] %v2328_v12   ;;  %v1806_v16 = vadd.f32 %v2385_v4, %v1805_v13  ;;  %v1842_v17 = vadd.f32 %v1841_v11, %v1827_v14 }
 0x1ae   : > { %v1843_v19 = vadd.f32 %v1842_v17, %v1828_v15  ;;  %v1807_v20 = vadd.f32 %v2386_v8, %v1806_v16 }
 0x1b0   : > { %v1844_v21 = vadd.f32 %v1843_v19, %v1829_v18 }
 0x1c6   : > { %v2389_v22 = vpop.f32.mrb[0].mxu1 }
 0x1c7   : > { %v1690_v23 = vpop.f32.mrb[1].mxu1  ;;  %v1832_v33 = vmul.f32 %v2389_v22, %v2389_v22 }
 0x1c8   : > { %v1808_v24 = vadd.f32 %v1807_v20, %v1690_v23  ;;  %v1830_v25 = vmul.f32 %v1690_v23, %v1690_v23  ;;  %v2390_v26 = vpop.f32.mrb[2].mxu1 }
 0x1c9   : > { %v2343_v27 = vpack.c.bf16 %v2390_v26, %v2389_v22  ;;  %v1693_v28 = vpop.f32.mrb[3].mxu1  ;;  %v1833_v36 = vmul.f32 %v2390_v26, %v2390_v26 }
 0x1ca   : > { %v1845_v29 = vadd.f32 %v1844_v21, %v1830_v25  ;;  %v2338_v30 = vpack.c.bf16 %v1693_v28, %v1690_v23  ;;  %v1809_v31 = vadd.f32 %v1808_v24, %v1693_v28  ;;  %v1831_v32 = vmul.f32 %v1693_v28, %v1693_v28 }
 0x1cb   : > { %2359 = vst [vmem:[%s3022_s25 + $0x28] sm:$0xff] %v2343_v27  }
 0x1cc   : > { %2358 = vst [vmem:[%s3022_s25 + $0x20] sm:$0xff] %v2338_v30   ;;  %v1810_v34 = vadd.f32 %v2389_v22, %v1809_v31  ;;  %v1846_v35 = vadd.f32 %v1845_v29, %v1831_v32 }
 0x1ce   : > { %v1847_v37 = vadd.f32 %v1846_v35, %v1832_v33  ;;  %v1811_v38 = vadd.f32 %v2390_v26, %v1810_v34 }
 0x1d0   : > { %v1848_v39 = vadd.f32 %v1847_v37, %v1833_v36 }
 0x1e3   : > { %v2393_v40 = vpop.f32.mrb[4].mxu1 }
 0x1e4   : > { %v1706_v41 = vpop.f32.mrb[5].mxu1  ;;  %v1836_v51 = vmul.f32 %v2393_v40, %v2393_v40 }
 0x1e5   : > { %v1812_v42 = vadd.f32 %v1811_v38, %v1706_v41  ;;  %v1834_v43 = vmul.f32 %v1706_v41, %v1706_v41  ;;  %v2394_v44 = vpop.f32.mrb[6].mxu1 }
 0x1e6   : > { %v2353_v45 = vpack.c.bf16 %v2394_v44, %v2393_v40  ;;  %v1709_v46 = vpop.f32.mrb[7].mxu1  ;;  %v1837_v54 = vmul.f32 %v2394_v44, %v2394_v44 }
 0x1e7   : > { %v1849_v47 = vadd.f32 %v1848_v39, %v1834_v43  ;;  %v2348_v48 = vpack.c.bf16 %v1709_v46, %v1706_v41  ;;  %v1813_v49 = vadd.f32 %v1812_v42, %v1709_v46  ;;  %v1835_v50 = vmul.f32 %v1709_v46, %v1709_v46 }
 0x1e8   : > { %2361 = vst [vmem:[%s3022_s25 + $0x38] sm:$0xff] %v2353_v45  }
 0x1e9   : > { %2360 = vst [vmem:[%s3022_s25 + $0x30] sm:$0xff] %v2348_v48   ;;  %v1814_v52 = vadd.f32 %v2393_v40, %v1813_v49  ;;  %v1850_v53 = vadd.f32 %v1849_v47, %v1835_v50 }
 0x1eb   : > { %v1815_v55 = vadd.f32 %v2394_v44, %v1814_v52  ;;  %v1851_v56 = vadd.f32 %v1850_v53, %v1836_v51 }
 0x1ed   : > { %v1816_v57 = vrot.slane %v1815_v55, 4  ;;  %v1852_v58 = vadd.f32 %v1851_v56, %v1837_v54 }
 0x1ef   : > { %v1817_v59 = vadd.f32 %v1816_v57, %v1815_v55  ;;  %v1853_v60 = vrot.slane %v1852_v58, 4 }
 0x1f1   : > { %v1818_v61 = vrot.slane %v1817_v59, 2  ;;  %v1854_v62 = vadd.f32 %v1853_v60, %v1852_v58 }
 0x1f3   : > { %v1819_v63 = vadd.f32 %v1818_v61, %v1817_v59  ;;  %v1855_v0 = vrot.slane %v1854_v62, 2 }
 0x1f5   : > { %v1820_v1 = vrot.slane %v1819_v63, 1  ;;  %v1856_v2 = vadd.f32 %v1855_v0, %v1854_v62 }
 0x1f7   : > { %v1857_v3 = vrot.slane %v1856_v2, 1  ;;  %v1821_v4 = vadd.f32 %v1820_v1, %v1819_v63 }
 0x1f9   : > { %v1858_v5 = vadd.f32 %v1857_v3, %v1856_v2 }
 0x1fb   : > { %v1860_v6 = vsel %vm1859_vm13, %v1821_v4, %v1858_v5 }
 0x1fc   : > { %1861 = vst [vmem:[%s214_s4] sm:$0x3] %v1860_v6 }
 0x1fd PF: > { %s14_s16 = sadd.s32 1, %s2613_s16   ;;  %s3057_s12 = smov %s2605_s14 }
 0x1fe   : > { %p11_p8 = scmp.ge.s32.totalorder %s14_s16, 6   ;;  %s3058_s13 = smov %s2609_s15 }
 0x1ff   : > { %s3059_s14 = smov %s3062_s17  ;;  %s3060_s15 = smov %s3066_s18 }
 0x200   :  { %13 = sbr.rel (!%p11_p8) target bundleno = 3 (0x3), region = 73 }

</bundles_post_ra>
